<compile_context>
chip_gen: v7x
topology: tpu7x:2x2x1
jax: 0.10.0
libtpu: 0.0.40
codegen_flags: <defaults>
</compile_context>

<pallas_src>
import jax
import jax.numpy as jnp
from jax.experimental import pallas as pl
from jax.experimental.pallas import tpu as pltpu

HIDDEN = 64          # nn.LSTM(hidden_size=64) — natural width, no gate padding
G_HID, G_OUT = 8, 4  # global_net widths
N_OUT = 10           # fusion output width

# Row layout of the f32 "small" parameter slab (width = 4*HIDDEN = 256).
ROW_B0, ROW_B1, ROW_BG1, ROW_BG2, ROW_BF = 0, 1, 2, 3, 4
ROW_WG1 = 8      # global_net Linear(G, 8) weight   (G rows)
ROW_WG2 = 16     # global_net Linear(8, 4) weight   (8 rows)
ROW_WFL = 24     # fusion weight, lstm half         (64 rows)
ROW_WFG = 88     # fusion weight, global half       (4 rows)
SMALL_ROWS = 96


def forecaster_kernel(x_ts_ref, x_glob_ref, wl_ref, sm_ref, out_ref):
    H = HIDDEN
    H4 = 4 * H
    TB = x_ts_ref.shape[0]          # T * Bp (time-major, flattened)
    Bp = x_glob_ref.shape[0]        # padded batch
    F = x_ts_ref.shape[1]
    G = x_glob_ref.shape[1]
    T = TB // Bp

    # --- LSTM weight slab (bf16): rows [0:2H) = W_big, rows [2H:2H+F) = Wih0.
    w_big = wl_ref[0:2 * H, :]                       # (2H, 8H)  [[Wih1,Whh0],[Whh1,0]]
    wih0 = wl_ref[2 * H:2 * H + F, 0:H4]             # (F, 4H)
    b0 = sm_ref[ROW_B0:ROW_B0 + 1, 0:H4]             # (1, 4H) f32 (b_ih0 + b_hh0)
    b1 = sm_ref[ROW_B1:ROW_B1 + 1, 0:H4]             # (1, 4H) f32 (b_ih1 + b_hh1)

    # --- Hoisted layer-0 input projection: one batched matmul, bias folded in.
    x_proj = jnp.dot(x_ts_ref[...], wih0,
                     preferred_element_type=jnp.float32) + b0   # (T*Bp, 4H) f32

    def cell(gates, c):
        # packed gate order [i, f, o, g]: sigmoids are one contiguous block.
        s = jax.nn.sigmoid(gates[:, 0:3 * H])
        i = s[:, 0:H]
        f = s[:, H:2 * H]
        o = s[:, 2 * H:3 * H]
        g = jnp.tanh(gates[:, 3 * H:4 * H])
        c_new = f * c + i * g
        return o * jnp.tanh(c_new), c_new

    zeros = jnp.zeros((Bp, H), jnp.float32)
    c0, c1, h1 = zeros, zeros, zeros
    h1b = jnp.zeros((Bp, H), jnp.bfloat16)
    rec0 = None   # layer-0 recurrent term for the *next* step (wavefront)

    # Fully unrolled time loop (T = window_size = 8).
    for t in range(T):
        gates0 = x_proj[t * Bp:(t + 1) * Bp, :]
        if t > 0:                                   # t=0: h0==0 -> rec term is 0
            gates0 = gates0 + rec0
        h0, c0 = cell(gates0, c0)
        h0b = h0.astype(jnp.bfloat16)

        # Wavefront-fused matmul: columns [0:4H) -> layer-1 gates at step t,
        # columns [4H:8H) -> layer-0 recurrent term for step t+1.
        if t == 0:
            # h1_{-1} == 0 -> only the top (h0) half of W_big contributes.
            big = jnp.dot(h0b, w_big[0:H, :], preferred_element_type=jnp.float32)
        else:
            big = jnp.dot(jnp.concatenate([h0b, h1b], axis=1), w_big,
                          preferred_element_type=jnp.float32)
        gates1 = big[:, 0:H4] + b1
        rec0 = big[:, H4:2 * H4]

        # inter-layer dropout(p=0.1) is identity at inference.
        h1, c1 = cell(gates1, c1)
        h1b = h1.astype(jnp.bfloat16)

    # lstm_out = lstm_out[:, -1, :] == final hidden state of the top layer.
    # self.lstm_dropout is identity at inference; use_attention=False.

    # global_net: Linear(G, 8) -> Tanh -> Dropout(id) -> Linear(8, 4) -> Tanh
    wg1 = sm_ref[ROW_WG1:ROW_WG1 + G, 0:G_HID]                     # (G, 8)
    wg2 = sm_ref[ROW_WG2:ROW_WG2 + G_HID, 0:G_OUT]                 # (8, 4)
    g = jnp.tanh(jnp.dot(x_glob_ref[...], wg1,
                         preferred_element_type=jnp.float32)
                 + sm_ref[ROW_BG1:ROW_BG1 + 1, 0:G_HID])
    g = jnp.tanh(jnp.dot(g, wg2, preferred_element_type=jnp.float32)
                 + sm_ref[ROW_BG2:ROW_BG2 + 1, 0:G_OUT])

    # fusion = Linear(64 + 4, 10) over cat((lstm_out, global_out), dim=1);
    # implemented as split matmuls summed (identical to matmul over concat).
    wf_lstm = sm_ref[ROW_WFL:ROW_WFL + H, 0:N_OUT]                 # (64, 10)
    wf_glob = sm_ref[ROW_WFG:ROW_WFG + G_OUT, 0:N_OUT]             # (4, 10)
    out = (jnp.dot(h1, wf_lstm, preferred_element_type=jnp.float32)
           + jnp.dot(g, wf_glob, preferred_element_type=jnp.float32)
           + sm_ref[ROW_BF:ROW_BF + 1, 0:N_OUT])
    out_ref[...] = out.astype(out_ref.dtype)


@jax.jit
def forecaster_forward(x_ts, x_glob, w_lstm, w_small):
    """x_ts: (B, T, F) batch_first like PyTorch; x_glob: (B, G)."""
    B, T, F = x_ts.shape
    Bp = max(8, -(-B // 8) * 8)    # pad batch to a sublane multiple

    # Time-major so each unrolled step reads a contiguous (Bp, F) sublane block.
    x_tm = jnp.transpose(x_ts, (1, 0, 2)).astype(jnp.float32)       # (T, B, F)
    x_tm = jnp.pad(x_tm, ((0, 0), (0, Bp - B), (0, 0)))
    x_flat = x_tm.reshape(T * Bp, F).astype(jnp.bfloat16)           # (T*Bp, F)
    xg = jnp.pad(x_glob.astype(jnp.float32), ((0, Bp - B), (0, 0)))

    # Problem footprint is ~0.25 MiB: keep everything VMEM-resident, no grid.
    vmem = pl.BlockSpec(memory_space=pltpu.MemorySpace.VMEM)
    out = pl.pallas_call(
        forecaster_kernel,
        out_shape=jax.ShapeDtypeStruct((Bp, N_OUT), jnp.float32),
        in_specs=[vmem, vmem, vmem, vmem],
        out_specs=vmem,
        cost_estimate=pl.CostEstimate(flops=9_000_000,
                                      transcendentals=42_000,
                                      bytes_accessed=260_000),
    )(x_flat, xg, w_lstm, w_small)
    return out[:B]


def init_params(key, num_features, global_features):
    """Natural (PyTorch-like) shapes; weights pre-transposed to (in, out)."""
    H = HIDDEN
    ks = jax.random.split(key, 16)
    s = 0.1

    def rnd(k, shape):
        return (s * jax.random.normal(k, shape)).astype(jnp.float32)

    return {
        # LSTM layer 0 (input_size = num_features)
        'wih0': rnd(ks[0], (num_features, 4 * H)),
        'whh0': rnd(ks[1], (H, 4 * H)),
        'b0':   rnd(ks[2], (1, 4 * H)),          # b_ih + b_hh combined
        # LSTM layer 1 (input_size = H)
        'wih1': rnd(ks[3], (H, 4 * H)),
        'whh1': rnd(ks[4], (H, 4 * H)),
        'b1':   rnd(ks[5], (1, 4 * H)),
        # global_net
        'wg1': rnd(ks[6], (global_features, G_HID)),
        'bg1': rnd(ks[7], (1, G_HID)),
        'wg2': rnd(ks[8], (G_HID, G_OUT)),
        'bg2': rnd(ks[9], (1, G_OUT)),
        # fusion Linear(64 + 4, 10) split into lstm- and global-feeding halves
        'wf_lstm': rnd(ks[10], (H, N_OUT)),
        'wf_glob': rnd(ks[11], (G_OUT, N_OUT)),
        'bf':      rnd(ks[12], (1, N_OUT)),
    }


def pack_params(p):
    """Repack natural-shaped params into the kernel's 2-slab layout.

    Slab 1 (bf16): W_big = [[Wih1, Whh0], [Whh1, 0]] at rows [0:2H) and Wih0 at
    rows [2H:2H+F) — used by the wavefront-fused recurrence matmul.
    Slab 2 (f32): all biases + global_net + fusion weights at fixed row offsets.
    Gate columns are reordered from PyTorch's [i,f,g,o] to [i,f,o,g] so the
    kernel's three sigmoids act on one contiguous block.
    NOTE: when importing real PyTorch LSTM weights, b0/b1 must be the SUM of
    the per-layer b_ih and b_hh vectors.
    """
    H = HIDDEN
    H4 = 4 * H
    F = p['wih0'].shape[0]
    G = p['wg1'].shape[0]

    def ro(w):                                   # reorder gates [i,f,g,o]->[i,f,o,g]
        K = w.shape[0]
        w4 = w.reshape(K, 4, H)
        return jnp.take(w4, jnp.array([0, 1, 3, 2]), axis=1).reshape(K, H4)

    # --- bf16 LSTM slab ---------------------------------------------------
    w_big = jnp.zeros((2 * H, 2 * H4), jnp.float32)
    w_big = w_big.at[:H, :H4].set(ro(p['wih1']))        # gates1 <- h0
    w_big = w_big.at[:H, H4:].set(ro(p['whh0']))        # rec0_next <- h0
    w_big = w_big.at[H:, :H4].set(ro(p['whh1']))        # gates1 <- h1_prev

    lstm_rows = -(-(2 * H + F) // 16) * 16              # bf16 sublane tiling (16)
    w_lstm = jnp.zeros((lstm_rows, 2 * H4), jnp.float32)
    w_lstm = w_lstm.at[:2 * H, :].set(w_big)
    w_lstm = w_lstm.at[2 * H:2 * H + F, :H4].set(ro(p['wih0']))
    w_lstm = w_lstm.astype(jnp.bfloat16)

    # --- f32 small slab -----------------------------------------------------
    S = jnp.zeros((SMALL_ROWS, H4), jnp.float32)
    S = S.at[ROW_B0, :H4].set(ro(p['b0'])[0])
    S = S.at[ROW_B1, :H4].set(ro(p['b1'])[0])
    S = S.at[ROW_BG1, :G_HID].set(p['bg1'][0])
    S = S.at[ROW_BG2, :G_OUT].set(p['bg2'][0])
    S = S.at[ROW_BF, :N_OUT].set(p['bf'][0])
    S = S.at[ROW_WG1:ROW_WG1 + G, :G_HID].set(p['wg1'])
    S = S.at[ROW_WG2:ROW_WG2 + G_HID, :G_OUT].set(p['wg2'])
    S = S.at[ROW_WFL:ROW_WFL + H, :N_OUT].set(p['wf_lstm'])
    S = S.at[ROW_WFG:ROW_WFG + G_OUT, :N_OUT].set(p['wf_glob'])

    return w_lstm, S


def reference_forward(x_ts, x_glob, p):
    """Pure-JAX f32 reference mirroring the PyTorch forward (eval mode)."""
    B, T, F = x_ts.shape
    H = HIDDEN
    h0 = c0 = h1 = c1 = jnp.zeros((B, H), jnp.float32)

    def cell(x, h, c, wih, whh, b):
        g = x @ wih + h @ whh + b
        i = jax.nn.sigmoid(g[:, :H])
        f = jax.nn.sigmoid(g[:, H:2 * H])
        gg = jnp.tanh(g[:, 2 * H:3 * H])
        o = jax.nn.sigmoid(g[:, 3 * H:])
        c = f * c + i * gg
        return o * jnp.tanh(c), c

    for t in range(T):
        h0, c0 = cell(x_ts[:, t], h0, c0, p['wih0'], p['whh0'], p['b0'])
        h0_, c1_ = h0, c1
        h1, c1 = cell(h0_, h1, c1_, p['wih1'], p['whh1'], p['b1'])
    g = jnp.tanh(x_glob @ p['wg1'] + p['bg1'])
    g = jnp.tanh(g @ p['wg2'] + p['bg2'])
    return h1 @ p['wf_lstm'] + g @ p['wf_glob'] + p['bf']


if __name__ == "__main__":
    B, T = 4, 8                 # batch, window_size
    NUM_FEATURES = 8
    GLOBAL_FEATURES = 6

    key = jax.random.PRNGKey(0)
    k_x, k_g, k_p = jax.random.split(key, 3)
    x_time_series = jax.random.normal(k_x, (B, T, NUM_FEATURES), jnp.float32)
    x_global = jax.random.normal(k_g, (B, GLOBAL_FEATURES), jnp.float32)
    params = init_params(k_p, NUM_FEATURES, GLOBAL_FEATURES)
    w_lstm_slab, w_small_slab = pack_params(params)

    out = forecaster_forward(x_time_series, x_global, w_lstm_slab, w_small_slab)
    out = jax.block_until_ready(out)

    ref = reference_forward(x_time_series, x_global, params)
    assert out.shape == (B, 10)
    # Tolerance accounts for bf16 matmul operands (f32 accumulation) in the
    # 8-step recurrence; observed drift is ~1e-3, real bugs produce >1e-1.
    assert jnp.allclose(out, ref, atol=2e-2, rtol=2e-2), (
        "mismatch vs reference, max abs diff = "
        f"{float(jnp.max(jnp.abs(out - ref)))}")

    print("KERNEL_OK")
</pallas_src>

<mosaic_0001>
module attributes {stable_mosaic.version = 11 : i64} {
  func.func @forecaster_kernel(%arg0: memref<64x8xbf16, #tpu.memory_space<vmem>>, %arg1: memref<8x6xf32, #tpu.memory_space<vmem>>, %arg2: memref<144x512xbf16, #tpu.memory_space<vmem>>, %arg3: memref<96x256xf32, #tpu.memory_space<vmem>>, %arg4: memref<8x10xf32, #tpu.memory_space<vmem>>) attributes {dimension_semantics = [], scalar_prefetch = 0 : i64, scratch_operands = 0 : i64, tpu.core_type = #tpu.core_type<tc>} {
    %c0 = arith.constant 0 : index
    %c0_0 = arith.constant 0 : index
    %0 = vector.load %arg2[%c0, %c0_0] : memref<144x512xbf16, #tpu.memory_space<vmem>>, vector<128x512xbf16>
    %c128 = arith.constant 128 : index
    %c0_1 = arith.constant 0 : index
    %1 = vector.load %arg2[%c128, %c0_1] : memref<144x512xbf16, #tpu.memory_space<vmem>>, vector<8x256xbf16>
    %c0_2 = arith.constant 0 : index
    %c0_3 = arith.constant 0 : index
    %2 = vector.load %arg3[%c0_2, %c0_3] : memref<96x256xf32, #tpu.memory_space<vmem>>, vector<1x256xf32>
    %c1 = arith.constant 1 : index
    %c0_4 = arith.constant 0 : index
    %3 = vector.load %arg3[%c1, %c0_4] : memref<96x256xf32, #tpu.memory_space<vmem>>, vector<1x256xf32>
    %c0_5 = arith.constant 0 : index
    %c0_6 = arith.constant 0 : index
    %4 = vector.load %arg0[%c0_5, %c0_6] : memref<64x8xbf16, #tpu.memory_space<vmem>>, vector<64x8xbf16>
    %cst = arith.constant dense<0.000000e+00> : vector<64x256xf32>
    %5 = tpu.matmul %4, %1, %cst {dimension_numbers = #tpu.dot_dimension_numbers<[1], [0], [0], [1], [0, 0, 1, 1], [], []>} : vector<64x8xbf16>, vector<8x256xbf16>, vector<64x256xf32> -> vector<64x256xf32>
    %6 = vector.broadcast %2 : vector<1x256xf32> to vector<64x256xf32>
    %7 = arith.addf %5, %6 : vector<64x256xf32>
    %cst_7 = arith.constant 0.000000e+00 : f32
    %8 = vector.broadcast %cst_7 : f32 to vector<8x64xf32>
    %9 = vector.extract_strided_slice %7 {offsets = [0, 0], sizes = [8, 256], strides = [1, 1]} : vector<64x256xf32> to vector<8x256xf32>
    %10 = vector.extract_strided_slice %9 {offsets = [0, 0], sizes = [8, 192], strides = [1, 1]} : vector<8x256xf32> to vector<8x192xf32>
    %11 = arith.negf %10 : vector<8x192xf32>
    %12 = math.exp %11 : vector<8x192xf32>
    %cst_8 = arith.constant 1.000000e+00 : f32
    %13 = vector.broadcast %cst_8 : f32 to vector<8x192xf32>
    %14 = arith.addf %13, %12 : vector<8x192xf32>
    %15 = arith.divf %13, %14 : vector<8x192xf32>
    %16 = vector.extract_strided_slice %15 {offsets = [0, 0], sizes = [8, 64], strides = [1, 1]} : vector<8x192xf32> to vector<8x64xf32>
    %17 = vector.extract_strided_slice %15 {offsets = [0, 64], sizes = [8, 64], strides = [1, 1]} : vector<8x192xf32> to vector<8x64xf32>
    %18 = vector.extract_strided_slice %15 {offsets = [0, 128], sizes = [8, 64], strides = [1, 1]} : vector<8x192xf32> to vector<8x64xf32>
    %19 = vector.extract_strided_slice %9 {offsets = [0, 192], sizes = [8, 64], strides = [1, 1]} : vector<8x256xf32> to vector<8x64xf32>
    %20 = math.tanh %19 : vector<8x64xf32>
    %21 = arith.mulf %17, %8 : vector<8x64xf32>
    %22 = arith.mulf %16, %20 : vector<8x64xf32>
    %23 = arith.addf %21, %22 : vector<8x64xf32>
    %24 = math.tanh %23 : vector<8x64xf32>
    %25 = arith.mulf %18, %24 : vector<8x64xf32>
    %26 = arith.truncf %25 : vector<8x64xf32> to vector<8x64xbf16>
    %27 = vector.extract_strided_slice %0 {offsets = [0, 0], sizes = [64, 512], strides = [1, 1]} : vector<128x512xbf16> to vector<64x512xbf16>
    %cst_9 = arith.constant dense<0.000000e+00> : vector<8x512xf32>
    %28 = tpu.matmul %26, %27, %cst_9 {dimension_numbers = #tpu.dot_dimension_numbers<[1], [0], [0], [1], [0, 0, 1, 1], [], []>} : vector<8x64xbf16>, vector<64x512xbf16>, vector<8x512xf32> -> vector<8x512xf32>
    %29 = vector.extract_strided_slice %28 {offsets = [0, 0], sizes = [8, 256], strides = [1, 1]} : vector<8x512xf32> to vector<8x256xf32>
    %30 = vector.broadcast %3 : vector<1x256xf32> to vector<8x256xf32>
    %31 = arith.addf %29, %30 : vector<8x256xf32>
    %32 = vector.extract_strided_slice %28 {offsets = [0, 256], sizes = [8, 256], strides = [1, 1]} : vector<8x512xf32> to vector<8x256xf32>
    %33 = vector.extract_strided_slice %31 {offsets = [0, 0], sizes = [8, 192], strides = [1, 1]} : vector<8x256xf32> to vector<8x192xf32>
    %34 = arith.negf %33 : vector<8x192xf32>
    %35 = math.exp %34 : vector<8x192xf32>
    %cst_10 = arith.constant 1.000000e+00 : f32
    %36 = vector.broadcast %cst_10 : f32 to vector<8x192xf32>
    %37 = arith.addf %36, %35 : vector<8x192xf32>
    %38 = arith.divf %36, %37 : vector<8x192xf32>
    %39 = vector.extract_strided_slice %38 {offsets = [0, 0], sizes = [8, 64], strides = [1, 1]} : vector<8x192xf32> to vector<8x64xf32>
    %40 = vector.extract_strided_slice %38 {offsets = [0, 64], sizes = [8, 64], strides = [1, 1]} : vector<8x192xf32> to vector<8x64xf32>
    %41 = vector.extract_strided_slice %38 {offsets = [0, 128], sizes = [8, 64], strides = [1, 1]} : vector<8x192xf32> to vector<8x64xf32>
    %42 = vector.extract_strided_slice %31 {offsets = [0, 192], sizes = [8, 64], strides = [1, 1]} : vector<8x256xf32> to vector<8x64xf32>
    %43 = math.tanh %42 : vector<8x64xf32>
    %44 = arith.mulf %40, %8 : vector<8x64xf32>
    %45 = arith.mulf %39, %43 : vector<8x64xf32>
    %46 = arith.addf %44, %45 : vector<8x64xf32>
    %47 = math.tanh %46 : vector<8x64xf32>
    %48 = arith.mulf %41, %47 : vector<8x64xf32>
    %49 = arith.truncf %48 : vector<8x64xf32> to vector<8x64xbf16>
    %50 = vector.extract_strided_slice %7 {offsets = [8, 0], sizes = [8, 256], strides = [1, 1]} : vector<64x256xf32> to vector<8x256xf32>
    %51 = arith.addf %50, %32 : vector<8x256xf32>
    %52 = vector.extract_strided_slice %51 {offsets = [0, 0], sizes = [8, 192], strides = [1, 1]} : vector<8x256xf32> to vector<8x192xf32>
    %53 = arith.negf %52 : vector<8x192xf32>
    %54 = math.exp %53 : vector<8x192xf32>
    %cst_11 = arith.constant 1.000000e+00 : f32
    %55 = vector.broadcast %cst_11 : f32 to vector<8x192xf32>
    %56 = arith.addf %55, %54 : vector<8x192xf32>
    %57 = arith.divf %55, %56 : vector<8x192xf32>
    %58 = vector.extract_strided_slice %57 {offsets = [0, 0], sizes = [8, 64], strides = [1, 1]} : vector<8x192xf32> to vector<8x64xf32>
    %59 = vector.extract_strided_slice %57 {offsets = [0, 64], sizes = [8, 64], strides = [1, 1]} : vector<8x192xf32> to vector<8x64xf32>
    %60 = vector.extract_strided_slice %57 {offsets = [0, 128], sizes = [8, 64], strides = [1, 1]} : vector<8x192xf32> to vector<8x64xf32>
    %61 = vector.extract_strided_slice %51 {offsets = [0, 192], sizes = [8, 64], strides = [1, 1]} : vector<8x256xf32> to vector<8x64xf32>
    %62 = math.tanh %61 : vector<8x64xf32>
    %63 = arith.mulf %59, %23 : vector<8x64xf32>
    %64 = arith.mulf %58, %62 : vector<8x64xf32>
    %65 = arith.addf %63, %64 : vector<8x64xf32>
    %66 = math.tanh %65 : vector<8x64xf32>
    %67 = arith.mulf %60, %66 : vector<8x64xf32>
    %68 = arith.truncf %67 : vector<8x64xf32> to vector<8x64xbf16>
    %69 = tpu.concatenate %68, %49 in 1 : vector<8x64xbf16>, vector<8x64xbf16> -> vector<8x128xbf16>
    %cst_12 = arith.constant dense<0.000000e+00> : vector<8x512xf32>
    %70 = tpu.matmul %69, %0, %cst_12 {dimension_numbers = #tpu.dot_dimension_numbers<[1], [0], [0], [1], [0, 0, 1, 1], [], []>} : vector<8x128xbf16>, vector<128x512xbf16>, vector<8x512xf32> -> vector<8x512xf32>
    %71 = vector.extract_strided_slice %70 {offsets = [0, 0], sizes = [8, 256], strides = [1, 1]} : vector<8x512xf32> to vector<8x256xf32>
    %72 = vector.broadcast %3 : vector<1x256xf32> to vector<8x256xf32>
    %73 = arith.addf %71, %72 : vector<8x256xf32>
    %74 = vector.extract_strided_slice %70 {offsets = [0, 256], sizes = [8, 256], strides = [1, 1]} : vector<8x512xf32> to vector<8x256xf32>
    %75 = vector.extract_strided_slice %73 {offsets = [0, 0], sizes = [8, 192], strides = [1, 1]} : vector<8x256xf32> to vector<8x192xf32>
    %76 = arith.negf %75 : vector<8x192xf32>
    %77 = math.exp %76 : vector<8x192xf32>
    %cst_13 = arith.constant 1.000000e+00 : f32
    %78 = vector.broadcast %cst_13 : f32 to vector<8x192xf32>
    %79 = arith.addf %78, %77 : vector<8x192xf32>
    %80 = arith.divf %78, %79 : vector<8x192xf32>
    %81 = vector.extract_strided_slice %80 {offsets = [0, 0], sizes = [8, 64], strides = [1, 1]} : vector<8x192xf32> to vector<8x64xf32>
    %82 = vector.extract_strided_slice %80 {offsets = [0, 64], sizes = [8, 64], strides = [1, 1]} : vector<8x192xf32> to vector<8x64xf32>
    %83 = vector.extract_strided_slice %80 {offsets = [0, 128], sizes = [8, 64], strides = [1, 1]} : vector<8x192xf32> to vector<8x64xf32>
    %84 = vector.extract_strided_slice %73 {offsets = [0, 192], sizes = [8, 64], strides = [1, 1]} : vector<8x256xf32> to vector<8x64xf32>
    %85 = math.tanh %84 : vector<8x64xf32>
    %86 = arith.mulf %82, %46 : vector<8x64xf32>
    %87 = arith.mulf %81, %85 : vector<8x64xf32>
    %88 = arith.addf %86, %87 : vector<8x64xf32>
    %89 = math.tanh %88 : vector<8x64xf32>
    %90 = arith.mulf %83, %89 : vector<8x64xf32>
    %91 = arith.truncf %90 : vector<8x64xf32> to vector<8x64xbf16>
    %92 = vector.extract_strided_slice %7 {offsets = [16, 0], sizes = [8, 256], strides = [1, 1]} : vector<64x256xf32> to vector<8x256xf32>
    %93 = arith.addf %92, %74 : vector<8x256xf32>
    %94 = vector.extract_strided_slice %93 {offsets = [0, 0], sizes = [8, 192], strides = [1, 1]} : vector<8x256xf32> to vector<8x192xf32>
    %95 = arith.negf %94 : vector<8x192xf32>
    %96 = math.exp %95 : vector<8x192xf32>
    %cst_14 = arith.constant 1.000000e+00 : f32
    %97 = vector.broadcast %cst_14 : f32 to vector<8x192xf32>
    %98 = arith.addf %97, %96 : vector<8x192xf32>
    %99 = arith.divf %97, %98 : vector<8x192xf32>
    %100 = vector.extract_strided_slice %99 {offsets = [0, 0], sizes = [8, 64], strides = [1, 1]} : vector<8x192xf32> to vector<8x64xf32>
    %101 = vector.extract_strided_slice %99 {offsets = [0, 64], sizes = [8, 64], strides = [1, 1]} : vector<8x192xf32> to vector<8x64xf32>
    %102 = vector.extract_strided_slice %99 {offsets = [0, 128], sizes = [8, 64], strides = [1, 1]} : vector<8x192xf32> to vector<8x64xf32>
    %103 = vector.extract_strided_slice %93 {offsets = [0, 192], sizes = [8, 64], strides = [1, 1]} : vector<8x256xf32> to vector<8x64xf32>
    %104 = math.tanh %103 : vector<8x64xf32>
    %105 = arith.mulf %101, %65 : vector<8x64xf32>
    %106 = arith.mulf %100, %104 : vector<8x64xf32>
    %107 = arith.addf %105, %106 : vector<8x64xf32>
    %108 = math.tanh %107 : vector<8x64xf32>
    %109 = arith.mulf %102, %108 : vector<8x64xf32>
    %110 = arith.truncf %109 : vector<8x64xf32> to vector<8x64xbf16>
    %111 = tpu.concatenate %110, %91 in 1 : vector<8x64xbf16>, vector<8x64xbf16> -> vector<8x128xbf16>
    %cst_15 = arith.constant dense<0.000000e+00> : vector<8x512xf32>
    %112 = tpu.matmul %111, %0, %cst_15 {dimension_numbers = #tpu.dot_dimension_numbers<[1], [0], [0], [1], [0, 0, 1, 1], [], []>} : vector<8x128xbf16>, vector<128x512xbf16>, vector<8x512xf32> -> vector<8x512xf32>
    %113 = vector.extract_strided_slice %112 {offsets = [0, 0], sizes = [8, 256], strides = [1, 1]} : vector<8x512xf32> to vector<8x256xf32>
    %114 = vector.broadcast %3 : vector<1x256xf32> to vector<8x256xf32>
    %115 = arith.addf %113, %114 : vector<8x256xf32>
    %116 = vector.extract_strided_slice %112 {offsets = [0, 256], sizes = [8, 256], strides = [1, 1]} : vector<8x512xf32> to vector<8x256xf32>
    %117 = vector.extract_strided_slice %115 {offsets = [0, 0], sizes = [8, 192], strides = [1, 1]} : vector<8x256xf32> to vector<8x192xf32>
    %118 = arith.negf %117 : vector<8x192xf32>
    %119 = math.exp %118 : vector<8x192xf32>
    %cst_16 = arith.constant 1.000000e+00 : f32
    %120 = vector.broadcast %cst_16 : f32 to vector<8x192xf32>
    %121 = arith.addf %120, %119 : vector<8x192xf32>
    %122 = arith.divf %120, %121 : vector<8x192xf32>
    %123 = vector.extract_strided_slice %122 {offsets = [0, 0], sizes = [8, 64], strides = [1, 1]} : vector<8x192xf32> to vector<8x64xf32>
    %124 = vector.extract_strided_slice %122 {offsets = [0, 64], sizes = [8, 64], strides = [1, 1]} : vector<8x192xf32> to vector<8x64xf32>
    %125 = vector.extract_strided_slice %122 {offsets = [0, 128], sizes = [8, 64], strides = [1, 1]} : vector<8x192xf32> to vector<8x64xf32>
    %126 = vector.extract_strided_slice %115 {offsets = [0, 192], sizes = [8, 64], strides = [1, 1]} : vector<8x256xf32> to vector<8x64xf32>
    %127 = math.tanh %126 : vector<8x64xf32>
    %128 = arith.mulf %124, %88 : vector<8x64xf32>
    %129 = arith.mulf %123, %127 : vector<8x64xf32>
    %130 = arith.addf %128, %129 : vector<8x64xf32>
    %131 = math.tanh %130 : vector<8x64xf32>
    %132 = arith.mulf %125, %131 : vector<8x64xf32>
    %133 = arith.truncf %132 : vector<8x64xf32> to vector<8x64xbf16>
    %134 = vector.extract_strided_slice %7 {offsets = [24, 0], sizes = [8, 256], strides = [1, 1]} : vector<64x256xf32> to vector<8x256xf32>
    %135 = arith.addf %134, %116 : vector<8x256xf32>
    %136 = vector.extract_strided_slice %135 {offsets = [0, 0], sizes = [8, 192], strides = [1, 1]} : vector<8x256xf32> to vector<8x192xf32>
    %137 = arith.negf %136 : vector<8x192xf32>
    %138 = math.exp %137 : vector<8x192xf32>
    %cst_17 = arith.constant 1.000000e+00 : f32
    %139 = vector.broadcast %cst_17 : f32 to vector<8x192xf32>
    %140 = arith.addf %139, %138 : vector<8x192xf32>
    %141 = arith.divf %139, %140 : vector<8x192xf32>
    %142 = vector.extract_strided_slice %141 {offsets = [0, 0], sizes = [8, 64], strides = [1, 1]} : vector<8x192xf32> to vector<8x64xf32>
    %143 = vector.extract_strided_slice %141 {offsets = [0, 64], sizes = [8, 64], strides = [1, 1]} : vector<8x192xf32> to vector<8x64xf32>
    %144 = vector.extract_strided_slice %141 {offsets = [0, 128], sizes = [8, 64], strides = [1, 1]} : vector<8x192xf32> to vector<8x64xf32>
    %145 = vector.extract_strided_slice %135 {offsets = [0, 192], sizes = [8, 64], strides = [1, 1]} : vector<8x256xf32> to vector<8x64xf32>
    %146 = math.tanh %145 : vector<8x64xf32>
    %147 = arith.mulf %143, %107 : vector<8x64xf32>
    %148 = arith.mulf %142, %146 : vector<8x64xf32>
    %149 = arith.addf %147, %148 : vector<8x64xf32>
    %150 = math.tanh %149 : vector<8x64xf32>
    %151 = arith.mulf %144, %150 : vector<8x64xf32>
    %152 = arith.truncf %151 : vector<8x64xf32> to vector<8x64xbf16>
    %153 = tpu.concatenate %152, %133 in 1 : vector<8x64xbf16>, vector<8x64xbf16> -> vector<8x128xbf16>
    %cst_18 = arith.constant dense<0.000000e+00> : vector<8x512xf32>
    %154 = tpu.matmul %153, %0, %cst_18 {dimension_numbers = #tpu.dot_dimension_numbers<[1], [0], [0], [1], [0, 0, 1, 1], [], []>} : vector<8x128xbf16>, vector<128x512xbf16>, vector<8x512xf32> -> vector<8x512xf32>
    %155 = vector.extract_strided_slice %154 {offsets = [0, 0], sizes = [8, 256], strides = [1, 1]} : vector<8x512xf32> to vector<8x256xf32>
    %156 = vector.broadcast %3 : vector<1x256xf32> to vector<8x256xf32>
    %157 = arith.addf %155, %156 : vector<8x256xf32>
    %158 = vector.extract_strided_slice %154 {offsets = [0, 256], sizes = [8, 256], strides = [1, 1]} : vector<8x512xf32> to vector<8x256xf32>
    %159 = vector.extract_strided_slice %157 {offsets = [0, 0], sizes = [8, 192], strides = [1, 1]} : vector<8x256xf32> to vector<8x192xf32>
    %160 = arith.negf %159 : vector<8x192xf32>
    %161 = math.exp %160 : vector<8x192xf32>
    %cst_19 = arith.constant 1.000000e+00 : f32
    %162 = vector.broadcast %cst_19 : f32 to vector<8x192xf32>
    %163 = arith.addf %162, %161 : vector<8x192xf32>
    %164 = arith.divf %162, %163 : vector<8x192xf32>
    %165 = vector.extract_strided_slice %164 {offsets = [0, 0], sizes = [8, 64], strides = [1, 1]} : vector<8x192xf32> to vector<8x64xf32>
    %166 = vector.extract_strided_slice %164 {offsets = [0, 64], sizes = [8, 64], strides = [1, 1]} : vector<8x192xf32> to vector<8x64xf32>
    %167 = vector.extract_strided_slice %164 {offsets = [0, 128], sizes = [8, 64], strides = [1, 1]} : vector<8x192xf32> to vector<8x64xf32>
    %168 = vector.extract_strided_slice %157 {offsets = [0, 192], sizes = [8, 64], strides = [1, 1]} : vector<8x256xf32> to vector<8x64xf32>
    %169 = math.tanh %168 : vector<8x64xf32>
    %170 = arith.mulf %166, %130 : vector<8x64xf32>
    %171 = arith.mulf %165, %169 : vector<8x64xf32>
    %172 = arith.addf %170, %171 : vector<8x64xf32>
    %173 = math.tanh %172 : vector<8x64xf32>
    %174 = arith.mulf %167, %173 : vector<8x64xf32>
    %175 = arith.truncf %174 : vector<8x64xf32> to vector<8x64xbf16>
    %176 = vector.extract_strided_slice %7 {offsets = [32, 0], sizes = [8, 256], strides = [1, 1]} : vector<64x256xf32> to vector<8x256xf32>
    %177 = arith.addf %176, %158 : vector<8x256xf32>
    %178 = vector.extract_strided_slice %177 {offsets = [0, 0], sizes = [8, 192], strides = [1, 1]} : vector<8x256xf32> to vector<8x192xf32>
    %179 = arith.negf %178 : vector<8x192xf32>
    %180 = math.exp %179 : vector<8x192xf32>
    %cst_20 = arith.constant 1.000000e+00 : f32
    %181 = vector.broadcast %cst_20 : f32 to vector<8x192xf32>
    %182 = arith.addf %181, %180 : vector<8x192xf32>
    %183 = arith.divf %181, %182 : vector<8x192xf32>
    %184 = vector.extract_strided_slice %183 {offsets = [0, 0], sizes = [8, 64], strides = [1, 1]} : vector<8x192xf32> to vector<8x64xf32>
    %185 = vector.extract_strided_slice %183 {offsets = [0, 64], sizes = [8, 64], strides = [1, 1]} : vector<8x192xf32> to vector<8x64xf32>
    %186 = vector.extract_strided_slice %183 {offsets = [0, 128], sizes = [8, 64], strides = [1, 1]} : vector<8x192xf32> to vector<8x64xf32>
    %187 = vector.extract_strided_slice %177 {offsets = [0, 192], sizes = [8, 64], strides = [1, 1]} : vector<8x256xf32> to vector<8x64xf32>
    %188 = math.tanh %187 : vector<8x64xf32>
    %189 = arith.mulf %185, %149 : vector<8x64xf32>
    %190 = arith.mulf %184, %188 : vector<8x64xf32>
    %191 = arith.addf %189, %190 : vector<8x64xf32>
    %192 = math.tanh %191 : vector<8x64xf32>
    %193 = arith.mulf %186, %192 : vector<8x64xf32>
    %194 = arith.truncf %193 : vector<8x64xf32> to vector<8x64xbf16>
    %195 = tpu.concatenate %194, %175 in 1 : vector<8x64xbf16>, vector<8x64xbf16> -> vector<8x128xbf16>
    %cst_21 = arith.constant dense<0.000000e+00> : vector<8x512xf32>
    %196 = tpu.matmul %195, %0, %cst_21 {dimension_numbers = #tpu.dot_dimension_numbers<[1], [0], [0], [1], [0, 0, 1, 1], [], []>} : vector<8x128xbf16>, vector<128x512xbf16>, vector<8x512xf32> -> vector<8x512xf32>
    %197 = vector.extract_strided_slice %196 {offsets = [0, 0], sizes = [8, 256], strides = [1, 1]} : vector<8x512xf32> to vector<8x256xf32>
    %198 = vector.broadcast %3 : vector<1x256xf32> to vector<8x256xf32>
    %199 = arith.addf %197, %198 : vector<8x256xf32>
    %200 = vector.extract_strided_slice %196 {offsets = [0, 256], sizes = [8, 256], strides = [1, 1]} : vector<8x512xf32> to vector<8x256xf32>
    %201 = vector.extract_strided_slice %199 {offsets = [0, 0], sizes = [8, 192], strides = [1, 1]} : vector<8x256xf32> to vector<8x192xf32>
    %202 = arith.negf %201 : vector<8x192xf32>
    %203 = math.exp %202 : vector<8x192xf32>
    %cst_22 = arith.constant 1.000000e+00 : f32
    %204 = vector.broadcast %cst_22 : f32 to vector<8x192xf32>
    %205 = arith.addf %204, %203 : vector<8x192xf32>
    %206 = arith.divf %204, %205 : vector<8x192xf32>
    %207 = vector.extract_strided_slice %206 {offsets = [0, 0], sizes = [8, 64], strides = [1, 1]} : vector<8x192xf32> to vector<8x64xf32>
    %208 = vector.extract_strided_slice %206 {offsets = [0, 64], sizes = [8, 64], strides = [1, 1]} : vector<8x192xf32> to vector<8x64xf32>
    %209 = vector.extract_strided_slice %206 {offsets = [0, 128], sizes = [8, 64], strides = [1, 1]} : vector<8x192xf32> to vector<8x64xf32>
    %210 = vector.extract_strided_slice %199 {offsets = [0, 192], sizes = [8, 64], strides = [1, 1]} : vector<8x256xf32> to vector<8x64xf32>
    %211 = math.tanh %210 : vector<8x64xf32>
    %212 = arith.mulf %208, %172 : vector<8x64xf32>
    %213 = arith.mulf %207, %211 : vector<8x64xf32>
    %214 = arith.addf %212, %213 : vector<8x64xf32>
    %215 = math.tanh %214 : vector<8x64xf32>
    %216 = arith.mulf %209, %215 : vector<8x64xf32>
    %217 = arith.truncf %216 : vector<8x64xf32> to vector<8x64xbf16>
    %218 = vector.extract_strided_slice %7 {offsets = [40, 0], sizes = [8, 256], strides = [1, 1]} : vector<64x256xf32> to vector<8x256xf32>
    %219 = arith.addf %218, %200 : vector<8x256xf32>
    %220 = vector.extract_strided_slice %219 {offsets = [0, 0], sizes = [8, 192], strides = [1, 1]} : vector<8x256xf32> to vector<8x192xf32>
    %221 = arith.negf %220 : vector<8x192xf32>
    %222 = math.exp %221 : vector<8x192xf32>
    %cst_23 = arith.constant 1.000000e+00 : f32
    %223 = vector.broadcast %cst_23 : f32 to vector<8x192xf32>
    %224 = arith.addf %223, %222 : vector<8x192xf32>
    %225 = arith.divf %223, %224 : vector<8x192xf32>
    %226 = vector.extract_strided_slice %225 {offsets = [0, 0], sizes = [8, 64], strides = [1, 1]} : vector<8x192xf32> to vector<8x64xf32>
    %227 = vector.extract_strided_slice %225 {offsets = [0, 64], sizes = [8, 64], strides = [1, 1]} : vector<8x192xf32> to vector<8x64xf32>
    %228 = vector.extract_strided_slice %225 {offsets = [0, 128], sizes = [8, 64], strides = [1, 1]} : vector<8x192xf32> to vector<8x64xf32>
    %229 = vector.extract_strided_slice %219 {offsets = [0, 192], sizes = [8, 64], strides = [1, 1]} : vector<8x256xf32> to vector<8x64xf32>
    %230 = math.tanh %229 : vector<8x64xf32>
    %231 = arith.mulf %227, %191 : vector<8x64xf32>
    %232 = arith.mulf %226, %230 : vector<8x64xf32>
    %233 = arith.addf %231, %232 : vector<8x64xf32>
    %234 = math.tanh %233 : vector<8x64xf32>
    %235 = arith.mulf %228, %234 : vector<8x64xf32>
    %236 = arith.truncf %235 : vector<8x64xf32> to vector<8x64xbf16>
    %237 = tpu.concatenate %236, %217 in 1 : vector<8x64xbf16>, vector<8x64xbf16> -> vector<8x128xbf16>
    %cst_24 = arith.constant dense<0.000000e+00> : vector<8x512xf32>
    %238 = tpu.matmul %237, %0, %cst_24 {dimension_numbers = #tpu.dot_dimension_numbers<[1], [0], [0], [1], [0, 0, 1, 1], [], []>} : vector<8x128xbf16>, vector<128x512xbf16>, vector<8x512xf32> -> vector<8x512xf32>
    %239 = vector.extract_strided_slice %238 {offsets = [0, 0], sizes = [8, 256], strides = [1, 1]} : vector<8x512xf32> to vector<8x256xf32>
    %240 = vector.broadcast %3 : vector<1x256xf32> to vector<8x256xf32>
    %241 = arith.addf %239, %240 : vector<8x256xf32>
    %242 = vector.extract_strided_slice %238 {offsets = [0, 256], sizes = [8, 256], strides = [1, 1]} : vector<8x512xf32> to vector<8x256xf32>
    %243 = vector.extract_strided_slice %241 {offsets = [0, 0], sizes = [8, 192], strides = [1, 1]} : vector<8x256xf32> to vector<8x192xf32>
    %244 = arith.negf %243 : vector<8x192xf32>
    %245 = math.exp %244 : vector<8x192xf32>
    %cst_25 = arith.constant 1.000000e+00 : f32
    %246 = vector.broadcast %cst_25 : f32 to vector<8x192xf32>
    %247 = arith.addf %246, %245 : vector<8x192xf32>
    %248 = arith.divf %246, %247 : vector<8x192xf32>
    %249 = vector.extract_strided_slice %248 {offsets = [0, 0], sizes = [8, 64], strides = [1, 1]} : vector<8x192xf32> to vector<8x64xf32>
    %250 = vector.extract_strided_slice %248 {offsets = [0, 64], sizes = [8, 64], strides = [1, 1]} : vector<8x192xf32> to vector<8x64xf32>
    %251 = vector.extract_strided_slice %248 {offsets = [0, 128], sizes = [8, 64], strides = [1, 1]} : vector<8x192xf32> to vector<8x64xf32>
    %252 = vector.extract_strided_slice %241 {offsets = [0, 192], sizes = [8, 64], strides = [1, 1]} : vector<8x256xf32> to vector<8x64xf32>
    %253 = math.tanh %252 : vector<8x64xf32>
    %254 = arith.mulf %250, %214 : vector<8x64xf32>
    %255 = arith.mulf %249, %253 : vector<8x64xf32>
    %256 = arith.addf %254, %255 : vector<8x64xf32>
    %257 = math.tanh %256 : vector<8x64xf32>
    %258 = arith.mulf %251, %257 : vector<8x64xf32>
    %259 = arith.truncf %258 : vector<8x64xf32> to vector<8x64xbf16>
    %260 = vector.extract_strided_slice %7 {offsets = [48, 0], sizes = [8, 256], strides = [1, 1]} : vector<64x256xf32> to vector<8x256xf32>
    %261 = arith.addf %260, %242 : vector<8x256xf32>
    %262 = vector.extract_strided_slice %261 {offsets = [0, 0], sizes = [8, 192], strides = [1, 1]} : vector<8x256xf32> to vector<8x192xf32>
    %263 = arith.negf %262 : vector<8x192xf32>
    %264 = math.exp %263 : vector<8x192xf32>
    %cst_26 = arith.constant 1.000000e+00 : f32
    %265 = vector.broadcast %cst_26 : f32 to vector<8x192xf32>
    %266 = arith.addf %265, %264 : vector<8x192xf32>
    %267 = arith.divf %265, %266 : vector<8x192xf32>
    %268 = vector.extract_strided_slice %267 {offsets = [0, 0], sizes = [8, 64], strides = [1, 1]} : vector<8x192xf32> to vector<8x64xf32>
    %269 = vector.extract_strided_slice %267 {offsets = [0, 64], sizes = [8, 64], strides = [1, 1]} : vector<8x192xf32> to vector<8x64xf32>
    %270 = vector.extract_strided_slice %267 {offsets = [0, 128], sizes = [8, 64], strides = [1, 1]} : vector<8x192xf32> to vector<8x64xf32>
    %271 = vector.extract_strided_slice %261 {offsets = [0, 192], sizes = [8, 64], strides = [1, 1]} : vector<8x256xf32> to vector<8x64xf32>
    %272 = math.tanh %271 : vector<8x64xf32>
    %273 = arith.mulf %269, %233 : vector<8x64xf32>
    %274 = arith.mulf %268, %272 : vector<8x64xf32>
    %275 = arith.addf %273, %274 : vector<8x64xf32>
    %276 = math.tanh %275 : vector<8x64xf32>
    %277 = arith.mulf %270, %276 : vector<8x64xf32>
    %278 = arith.truncf %277 : vector<8x64xf32> to vector<8x64xbf16>
    %279 = tpu.concatenate %278, %259 in 1 : vector<8x64xbf16>, vector<8x64xbf16> -> vector<8x128xbf16>
    %cst_27 = arith.constant dense<0.000000e+00> : vector<8x512xf32>
    %280 = tpu.matmul %279, %0, %cst_27 {dimension_numbers = #tpu.dot_dimension_numbers<[1], [0], [0], [1], [0, 0, 1, 1], [], []>} : vector<8x128xbf16>, vector<128x512xbf16>, vector<8x512xf32> -> vector<8x512xf32>
    %281 = vector.extract_strided_slice %280 {offsets = [0, 0], sizes = [8, 256], strides = [1, 1]} : vector<8x512xf32> to vector<8x256xf32>
    %282 = vector.broadcast %3 : vector<1x256xf32> to vector<8x256xf32>
    %283 = arith.addf %281, %282 : vector<8x256xf32>
    %284 = vector.extract_strided_slice %280 {offsets = [0, 256], sizes = [8, 256], strides = [1, 1]} : vector<8x512xf32> to vector<8x256xf32>
    %285 = vector.extract_strided_slice %283 {offsets = [0, 0], sizes = [8, 192], strides = [1, 1]} : vector<8x256xf32> to vector<8x192xf32>
    %286 = arith.negf %285 : vector<8x192xf32>
    %287 = math.exp %286 : vector<8x192xf32>
    %cst_28 = arith.constant 1.000000e+00 : f32
    %288 = vector.broadcast %cst_28 : f32 to vector<8x192xf32>
    %289 = arith.addf %288, %287 : vector<8x192xf32>
    %290 = arith.divf %288, %289 : vector<8x192xf32>
    %291 = vector.extract_strided_slice %290 {offsets = [0, 0], sizes = [8, 64], strides = [1, 1]} : vector<8x192xf32> to vector<8x64xf32>
    %292 = vector.extract_strided_slice %290 {offsets = [0, 64], sizes = [8, 64], strides = [1, 1]} : vector<8x192xf32> to vector<8x64xf32>
    %293 = vector.extract_strided_slice %290 {offsets = [0, 128], sizes = [8, 64], strides = [1, 1]} : vector<8x192xf32> to vector<8x64xf32>
    %294 = vector.extract_strided_slice %283 {offsets = [0, 192], sizes = [8, 64], strides = [1, 1]} : vector<8x256xf32> to vector<8x64xf32>
    %295 = math.tanh %294 : vector<8x64xf32>
    %296 = arith.mulf %292, %256 : vector<8x64xf32>
    %297 = arith.mulf %291, %295 : vector<8x64xf32>
    %298 = arith.addf %296, %297 : vector<8x64xf32>
    %299 = math.tanh %298 : vector<8x64xf32>
    %300 = arith.mulf %293, %299 : vector<8x64xf32>
    %301 = arith.truncf %300 : vector<8x64xf32> to vector<8x64xbf16>
    %302 = vector.extract_strided_slice %7 {offsets = [56, 0], sizes = [8, 256], strides = [1, 1]} : vector<64x256xf32> to vector<8x256xf32>
    %303 = arith.addf %302, %284 : vector<8x256xf32>
    %304 = vector.extract_strided_slice %303 {offsets = [0, 0], sizes = [8, 192], strides = [1, 1]} : vector<8x256xf32> to vector<8x192xf32>
    %305 = arith.negf %304 : vector<8x192xf32>
    %306 = math.exp %305 : vector<8x192xf32>
    %cst_29 = arith.constant 1.000000e+00 : f32
    %307 = vector.broadcast %cst_29 : f32 to vector<8x192xf32>
    %308 = arith.addf %307, %306 : vector<8x192xf32>
    %309 = arith.divf %307, %308 : vector<8x192xf32>
    %310 = vector.extract_strided_slice %309 {offsets = [0, 0], sizes = [8, 64], strides = [1, 1]} : vector<8x192xf32> to vector<8x64xf32>
    %311 = vector.extract_strided_slice %309 {offsets = [0, 64], sizes = [8, 64], strides = [1, 1]} : vector<8x192xf32> to vector<8x64xf32>
    %312 = vector.extract_strided_slice %309 {offsets = [0, 128], sizes = [8, 64], strides = [1, 1]} : vector<8x192xf32> to vector<8x64xf32>
    %313 = vector.extract_strided_slice %303 {offsets = [0, 192], sizes = [8, 64], strides = [1, 1]} : vector<8x256xf32> to vector<8x64xf32>
    %314 = math.tanh %313 : vector<8x64xf32>
    %315 = arith.mulf %311, %275 : vector<8x64xf32>
    %316 = arith.mulf %310, %314 : vector<8x64xf32>
    %317 = arith.addf %315, %316 : vector<8x64xf32>
    %318 = math.tanh %317 : vector<8x64xf32>
    %319 = arith.mulf %312, %318 : vector<8x64xf32>
    %320 = arith.truncf %319 : vector<8x64xf32> to vector<8x64xbf16>
    %321 = tpu.concatenate %320, %301 in 1 : vector<8x64xbf16>, vector<8x64xbf16> -> vector<8x128xbf16>
    %cst_30 = arith.constant dense<0.000000e+00> : vector<8x512xf32>
    %322 = tpu.matmul %321, %0, %cst_30 {dimension_numbers = #tpu.dot_dimension_numbers<[1], [0], [0], [1], [0, 0, 1, 1], [], []>} : vector<8x128xbf16>, vector<128x512xbf16>, vector<8x512xf32> -> vector<8x512xf32>
    %323 = vector.extract_strided_slice %322 {offsets = [0, 0], sizes = [8, 256], strides = [1, 1]} : vector<8x512xf32> to vector<8x256xf32>
    %324 = vector.broadcast %3 : vector<1x256xf32> to vector<8x256xf32>
    %325 = arith.addf %323, %324 : vector<8x256xf32>
    %326 = vector.extract_strided_slice %325 {offsets = [0, 0], sizes = [8, 192], strides = [1, 1]} : vector<8x256xf32> to vector<8x192xf32>
    %327 = arith.negf %326 : vector<8x192xf32>
    %328 = math.exp %327 : vector<8x192xf32>
    %cst_31 = arith.constant 1.000000e+00 : f32
    %329 = vector.broadcast %cst_31 : f32 to vector<8x192xf32>
    %330 = arith.addf %329, %328 : vector<8x192xf32>
    %331 = arith.divf %329, %330 : vector<8x192xf32>
    %332 = vector.extract_strided_slice %331 {offsets = [0, 0], sizes = [8, 64], strides = [1, 1]} : vector<8x192xf32> to vector<8x64xf32>
    %333 = vector.extract_strided_slice %331 {offsets = [0, 64], sizes = [8, 64], strides = [1, 1]} : vector<8x192xf32> to vector<8x64xf32>
    %334 = vector.extract_strided_slice %331 {offsets = [0, 128], sizes = [8, 64], strides = [1, 1]} : vector<8x192xf32> to vector<8x64xf32>
    %335 = vector.extract_strided_slice %325 {offsets = [0, 192], sizes = [8, 64], strides = [1, 1]} : vector<8x256xf32> to vector<8x64xf32>
    %336 = math.tanh %335 : vector<8x64xf32>
    %337 = arith.mulf %333, %298 : vector<8x64xf32>
    %338 = arith.mulf %332, %336 : vector<8x64xf32>
    %339 = arith.addf %337, %338 : vector<8x64xf32>
    %340 = math.tanh %339 : vector<8x64xf32>
    %341 = arith.mulf %334, %340 : vector<8x64xf32>
    %c8 = arith.constant 8 : index
    %c0_32 = arith.constant 0 : index
    %342 = vector.load %arg3[%c8, %c0_32] : memref<96x256xf32, #tpu.memory_space<vmem>>, vector<6x8xf32>
    %c16 = arith.constant 16 : index
    %c0_33 = arith.constant 0 : index
    %343 = vector.load %arg3[%c16, %c0_33] : memref<96x256xf32, #tpu.memory_space<vmem>>, vector<8x4xf32>
    %c0_34 = arith.constant 0 : index
    %c0_35 = arith.constant 0 : index
    %344 = vector.load %arg1[%c0_34, %c0_35] : memref<8x6xf32, #tpu.memory_space<vmem>>, vector<8x6xf32>
    %cst_36 = arith.constant dense<0.000000e+00> : vector<8x8xf32>
    %345 = tpu.matmul %344, %342, %cst_36 {dimension_numbers = #tpu.dot_dimension_numbers<[1], [0], [0], [1], [0, 0, 1, 1], [], []>} : vector<8x6xf32>, vector<6x8xf32>, vector<8x8xf32> -> vector<8x8xf32>
    %c2 = arith.constant 2 : index
    %c0_37 = arith.constant 0 : index
    %346 = vector.load %arg3[%c2, %c0_37] : memref<96x256xf32, #tpu.memory_space<vmem>>, vector<1x8xf32>
    %347 = vector.broadcast %346 : vector<1x8xf32> to vector<8x8xf32>
    %348 = arith.addf %345, %347 : vector<8x8xf32>
    %349 = math.tanh %348 : vector<8x8xf32>
    %cst_38 = arith.constant dense<0.000000e+00> : vector<8x4xf32>
    %350 = tpu.matmul %349, %343, %cst_38 {dimension_numbers = #tpu.dot_dimension_numbers<[1], [0], [0], [1], [0, 0, 1, 1], [], []>} : vector<8x8xf32>, vector<8x4xf32>, vector<8x4xf32> -> vector<8x4xf32>
    %c3 = arith.constant 3 : index
    %c0_39 = arith.constant 0 : index
    %351 = vector.load %arg3[%c3, %c0_39] : memref<96x256xf32, #tpu.memory_space<vmem>>, vector<1x4xf32>
    %352 = vector.broadcast %351 : vector<1x4xf32> to vector<8x4xf32>
    %353 = arith.addf %350, %352 : vector<8x4xf32>
    %354 = math.tanh %353 : vector<8x4xf32>
    %c24 = arith.constant 24 : index
    %c0_40 = arith.constant 0 : index
    %355 = vector.load %arg3[%c24, %c0_40] : memref<96x256xf32, #tpu.memory_space<vmem>>, vector<64x10xf32>
    %c88 = arith.constant 88 : index
    %c0_41 = arith.constant 0 : index
    %356 = vector.load %arg3[%c88, %c0_41] : memref<96x256xf32, #tpu.memory_space<vmem>>, vector<4x10xf32>
    %cst_42 = arith.constant dense<0.000000e+00> : vector<8x10xf32>
    %357 = tpu.matmul %341, %355, %cst_42 {dimension_numbers = #tpu.dot_dimension_numbers<[1], [0], [0], [1], [0, 0, 1, 1], [], []>} : vector<8x64xf32>, vector<64x10xf32>, vector<8x10xf32> -> vector<8x10xf32>
    %cst_43 = arith.constant dense<0.000000e+00> : vector<8x10xf32>
    %358 = tpu.matmul %354, %356, %cst_43 {dimension_numbers = #tpu.dot_dimension_numbers<[1], [0], [0], [1], [0, 0, 1, 1], [], []>} : vector<8x4xf32>, vector<4x10xf32>, vector<8x10xf32> -> vector<8x10xf32>
    %359 = arith.addf %357, %358 : vector<8x10xf32>
    %c4 = arith.constant 4 : index
    %c0_44 = arith.constant 0 : index
    %360 = vector.load %arg3[%c4, %c0_44] : memref<96x256xf32, #tpu.memory_space<vmem>>, vector<1x10xf32>
    %361 = vector.broadcast %360 : vector<1x10xf32> to vector<8x10xf32>
    %362 = arith.addf %359, %361 : vector<8x10xf32>
    %c0_45 = arith.constant 0 : index
    %c0_46 = arith.constant 0 : index
    %363 = vector.load %arg4[%c0_45, %c0_46] : memref<8x10xf32, #tpu.memory_space<vmem>>, vector<8x10xf32>
    tpu.vector_store %arg4[%c0_45, %c0_46], %362 {strides = array<i32>} : memref<8x10xf32, #tpu.memory_space<vmem>>, vector<8x10xf32>,
    return
  }
}

</mosaic_0001>

<bundles_post_ra>
// kernel: forecaster_forward.1
= control target key start
LH: loop header
LB: loop body
LE: loop exit
PB: predicated region body
PF: predicated region fallthrough
CT: control target
= control target key end

     0   :  { %9 = vsyncpa [#allocation3], 0  ;;  %s3023_s0 = inlined_call_operand.vmem [shape: bf16[64,8], index: 0, kind: input, shape index: {}]   ;;  %s3024_s1 = inlined_call_operand.vmem [shape: f32[8,6], index: 1, kind: input, shape index: {}]   ;;  %s3025_s2 = inlined_call_operand.hbm [shape: bf16[144,512], index: 2, kind: input, shape index: {}]   ;;  %s3026_s3 = inlined_call_operand.hbm [shape: f32[96,256], index: 3, kind: input, shape index: {}]   ;;  %s3027_s4 = inlined_call_operand.vmem [shape: f32[8,10], index: 4, kind: output, shape index: {}]  }
   0x1   :  { %10 = vsyncpa [#allocation5], 0  ;;  %s2390_s15 = smov [#allocation2]   ;;  %s2342_s19 = scalar_lea.hbm %s3025_s2, 4608 }
   0x2   :  { %s20_s16 = sshll.u32 %s2390_s15, 4  ;;  %p2343_p0 = scmp.ne.s32.totalorder %s3025_s2, %s2342_s19  ;;  %s21_s16 = int_to_ptr.vmem [resolvable:$true] %s20_s16 }
   0x3   :  { %p2346_p1 = scmp.lt.u32.totalorder %s2342_s19, %s3025_s2 }
   0x5   :  { %p2348_p2 = pnand %p2346_p1, %p2343_p0 }
   0x7   :  { %2351 = shalt.err (!%p2348_p2)
}
   0x8   :  { %s2352_s24 = scalar_lea.vmem %s21_s16, 4608  ;;  %p2357_p4 = scmp.lt.s32.totalorder %s21_s16, %s21_s16 }
   0x9   :  { %p2353_p3 = scmp.ne.s32.totalorder %s21_s16, %s2352_s24  ;;  %p2358_p5 = scmp.lt.s32.totalorder %s2352_s24, %s2352_s24 }
   0xb   :  { %p2359_p6 = por %p2358_p5, %p2357_p4 }
   0xd   :  { %p2360_p7 = pnand %p2359_p6, %p2353_p3 }
   0xf   :  { %2363 = shalt.err (!%p2360_p7)
}
  0x10   :  { %s2391_s25 = smov 256   ;;  %s2392_s26 = smov 16  }
  0x11   :  { %26 = dma.hbm_to_vmem [thread:$0]  %s3025_s2, 4608, %s21_s16, [#allocation3], %s2391_s25, %s2391_s25, %s2392_s26  }
  0x12   :  { %s2393_s29 = smov [#allocation4]   ;;  %s2364_s7 = scalar_lea.hbm %s3026_s3, 3072 }
  0x13   :  { %s32_s30 = sshll.u32 %s2393_s29, 4  ;;  %p2365_p8 = scmp.ne.s32.totalorder %s3026_s3, %s2364_s7  ;;  %s33_s30 = int_to_ptr.vmem [resolvable:$true] %s32_s30 }
  0x14   :  { %p2368_p9 = scmp.lt.u32.totalorder %s2364_s7, %s3026_s3 }
  0x16   :  { %p2370_p10 = pnand %p2368_p9, %p2365_p8 }
  0x18   :  { %2373 = shalt.err (!%p2370_p10)
}
  0x19   :  { %s2374_s12 = scalar_lea.vmem %s33_s30, 3072  ;;  %p2379_p12 = scmp.lt.s32.totalorder %s33_s30, %s33_s30 }
  0x1a   :  { %p2375_p11 = scmp.ne.s32.totalorder %s33_s30, %s2374_s12  ;;  %p2380_p13 = scmp.lt.s32.totalorder %s2374_s12, %s2374_s12 }
  0x1c   :  { %p2381_p0 = por %p2380_p13, %p2379_p12 }
  0x1e   :  { %p2382_p1 = pnand %p2381_p0, %p2375_p11 }
  0x20   :  { %2385 = shalt.err (!%p2382_p1)
}
  0x21   :  { %38 = dma.hbm_to_vmem [thread:$0]  %s3026_s3, 3072, %s33_s30, [#allocation5], %s2391_s25, %s2391_s25, %s2392_s26  }
  0x22   :  { %2386 = dma.done.wait [#allocation3], 4608  }
  0x23   :  { %2387 = vsyncadd [#allocation3], 4294962688 }
  0x24   :  { %2388 = dma.done.wait [#allocation5], 3072  }
  0x25   :  { %2389 = vsyncadd [#allocation5], 4294964224  ;;  %v3028_v0 = vmov 0   ;;  %v78_v1 = vld [vmem:[#allocation2 + $0x100] sm:$0xff]  ;;  %vm139_vm0 = vcmask 1043456   ;;  %vm126_vm1 = vcmask 64512   ;;  %v91_v6 = vlaneseq }
  0x26   :  { %178 = vmatprep.mubr.bf16.mxu0 %v3028_v0  ;;  %366 = vmatprep.mubr.bf16.mxu1 %v3028_v0  ;;  %v1915_v2 = vcombine.high %v78_v1, %v78_v1  ;;  %v1914_v3 = vcombine.low %v78_v1, %v78_v1  ;;  %v2065_v4 = vld [vmem:[%s3023_s0] sm:$0xff]   ;;  %s2395_s3 = smov 64   ;;  %v2511_v37 = vld [vmem:[#allocation2 + $0xc] ss:$16 sps:$4 sm:$0xff]   ;;  %vm330_vm2 = vcmask 523264   ;;  %vm1591_vm3 = vcmask 1045504  }
  0x27   :  { %v2457_v7 = vshrl.u32 %v91_v6, 7  ;;  %v79_v9 = vld [vmem:[#allocation4] ss:$8 sm:$0x3]  ;;  %v2477_v26 = vld [vmem:[#allocation2 + $0x4] ss:$16 sps:$4 sm:$0xff]  }
  0x28   :  { %1916 = vmatprep.subr.msk.bf16.mxu0 %vm139_vm0, %v1915_v2  ;;  %v141_v5 = vsel %vm139_vm0, %v1914_v3, 0  ;;  %v2479_v27 = vld [vmem:[#allocation2] ss:$16 sps:$4 sm:$0xff]   ;;  %v2481_v28 = vld [vmem:[#allocation2 + $0x24] ss:$16 sps:$4 sm:$0xff]   ;;  %334 = vmatprep.subr.bf16.mxu1 %v2477_v26  ;;  %vm2397_vm4 = vmmov 0  }
  0x29   :  { %147 = vmatpush1.bf16.msra.mxu0 %v141_v5  ;;  %v97_v8 = vsub.s32 1, %v2457_v7  ;;  %v93_v17 = vsub.s32 0, %v2457_v7  ;;  %335 = vmatpush1.bf16.msra.mxu1 %v2479_v27  ;;  %v2486_v29 = vld [vmem:[#allocation2 + $0x20] ss:$16 sps:$4 sm:$0xff]   ;;  %v2490_v30 = vld [vmem:[#allocation2 + $0x44] ss:$16 sps:$4 sm:$0xff]  }
  0x2a   :  { %580 = vmatprep.subr.bf16.mxu0 %v2477_v26  ;;  %336 = vmatprep.subr.bf16.mxu1 %v2481_v28  ;;  %v2494_v31 = vld [vmem:[#allocation2 + $0x40] ss:$16 sps:$4 sm:$0xff]   ;;  %v2501_v32 = vld [vmem:[#allocation2 + $0x64] ss:$16 sps:$4 sm:$0xff]   ;;  %v2516_v45 = vld [vmem:[#allocation2 + $0x8] ss:$16 sps:$4 sm:$0xff]  }
  0x2b   :  { %v2462_v10 = vrot.slane %v79_v9, %v97_v8  ;;  %v2473_v18 = vrot.slane %v79_v9, %v93_v17  ;;  %v2503_v34 = vld [vmem:[#allocation2 + $0x60] ss:$16 sps:$4 sm:$0xff]   ;;  %v2518_v47 = vld [vmem:[#allocation2 + $0x2c] ss:$16 sps:$4 sm:$0xff]   ;;  %v2522_v48 = vld [vmem:[#allocation2 + $0x28] ss:$16 sps:$4 sm:$0xff]  }
  0x2c   :  { %1917 = vmatmul.mubr.msk.bf16.vlgmr.msra.gmra.mrb[0].mxu0 %vm126_vm1, %v2065_v4  ;;  %v2526_v49 = vld [vmem:[#allocation2 + $0x4c] ss:$16 sps:$4 sm:$0xff]   ;;  %v2529_v50 = vld [vmem:[#allocation2 + $0x48] ss:$16 sps:$4 sm:$0xff]   ;;  %vm1587_vm5 = vcmask 48128   ;;  %vm1750_vm6 = vcmask 31744  }
  0x2d   :  { %188 = vmatprep.mubr.bf16.mxu0 %v3028_v0  ;;  %581 = vmatpush1.bf16.msra.mxu0 %v2479_v27  ;;  %v2532_v51 = vld [vmem:[#allocation2 + $0x6c] ss:$16 sps:$4 sm:$0xff]   ;;  %v2535_v52 = vld [vmem:[#allocation2 + $0x68] ss:$16 sps:$4 sm:$0xff]   ;;  %vm1902_vm7 = vcmask 80896  }
  0x2e   :  { %582 = vmatprep.subr.bf16.mxu0 %v2481_v28  ;;  %337 = vmatpush1.bf16.msra.mxu1 %v2486_v29  ;;  %v81_v53 = vld [vmem:[#allocation4 + $0x1] ss:$8 sm:$0x3] }
  0x2f   :  { %338 = vmatprep.subr.bf16.mxu1 %v2490_v30  ;;  %v2551_v54 = vrot.slane %v81_v53, %v97_v8  ;;  %v2568_v8 = vrot.slane %v81_v53, %v93_v17  ;;  %v2600_v53 = vld [vmem:[#allocation2 + $0xa0] ss:$16 sps:$4 sm:$0xff]  }
  0x31   :  { %583 = vmatpush1.bf16.msra.mxu0 %v2486_v29 }
  0x32   :  { %584 = vmatprep.subr.bf16.mxu0 %v2490_v30  ;;  %339 = vmatpush1.bf16.msra.mxu1 %v2494_v31 }
  0x33   :  { %340 = vmatprep.subr.bf16.mxu1 %v2501_v32 }
  0x35   :  { %585 = vmatpush1.bf16.msra.mxu0 %v2494_v31 }
  0x36   :  { %586 = vmatprep.subr.bf16.mxu0 %v2501_v32  ;;  %341 = vmatpush1.bf16.msra.mxu1 %v2503_v34 }
  0x37   :  { %375 = vmatprep.subr.bf16.mxu1 %v2511_v37 }
  0x39   :  { %587 = vmatpush1.bf16.msra.mxu0 %v2503_v34 }
  0xff   :  { %v180_v11 = vpop.f32.mrb[0].mxu0 }
 0x100   :  { %v182_v12 = vpop.f32.mrb[1].mxu0  ;;  %v181_v19 = vadd.f32 %v180_v11, %v2473_v18 }
 0x101   :  { %v183_v13 = vadd.f32 %v182_v12, %v2462_v10  ;;  %v2465_v14 = vpop.f32.mrb[2].mxu0 }
 0x102   :  { %v2467_v15 = vpop.f32.mrb[3].mxu0  ;;  %v1921_v20 = vmul.f32 -1.442695, %v181_v19  ;;  %v185_v61 = vadd.f32 %v2465_v14, %v2473_v18 }
 0x103   :  { %2117 = vtanh.f32 %v183_v13  ;;  %v1922_v39 = vmul.f32 -1.442695, %v183_v13  ;;  %v187_v62 = vadd.f32 %v2467_v15, %v2462_v10 }
 0x104   :  { %2119 = vpow2.f32 %v1921_v20 }
 0x10d   :  { %v2118_v16 = vpop.eup %2117 }
 0x10e   :  { %234 = vrot.lane.b32.xlu0 %v2118_v16, %s2395_s3  ;;  %v2120_v21 = vpop.eup %2119 }
 0x10f   :  { %v225_v22 = vadd.f32 1.0, %v2120_v21 }
 0x111   :  { %2121 = vrcp.f32 %v225_v22 }
 0x11b   :  { %v2122_v23 = vpop.eup %2121 }
 0x11c   :  { %v232_v33 = vmul.f32 0.0, %v2122_v23 }
 0x180   :  { %v235_v24 = vpop.permute.xlu0 %234 }
 0x181   :  { %v237_v25 = vmul.f32 %v2122_v23, %v235_v24 }
 0x183   :  { %239 = vrot.lane.b32.xlu0 %v237_v25, %s2395_s3 }
 0x1f5   :  { %v240_v35 = vpop.permute.xlu0 %239 }
 0x1f6   :  { %v2507_v36 = vadd.f32 %v240_v35, %v232_v33 }
 0x1f8   :  { %2123 = vtanh.f32 %v2507_v36 }
 0x1f9   :  { %2125 = vpow2.f32 %v1922_v39 }
 0x202   :  { %v2124_v38 = vpop.eup %2123 }
 0x203   :  { %245 = vrot.lane.b32.xlu1 %v2124_v38, %s2395_s3  ;;  %v2126_v40 = vpop.eup %2125 }
 0x204   :  { %v226_v41 = vadd.f32 1.0, %v2126_v40  ;;  %v2090_v40 = vld [vmem:[%s3023_s0 + $0x8] sm:$0xff]  }
 0x205   :  { %1918 = vmatmul.mubr.msk.bf16.gmra.mrb[4].mxu0 %vm126_vm1, %v2090_v40 }
 0x206   :  { %2127 = vrcp.f32 %v226_v41  ;;  %v2584_v41 = vld [vmem:[#allocation2 + $0x84] ss:$16 sps:$4 sm:$0xff]   ;;  %198 = vmatprep.mubr.bf16.mxu0 %v3028_v0 }
 0x207   :  { %588 = vmatprep.subr.bf16.mxu0 %v2584_v41 }
 0x210   :  { %v2128_v42 = vpop.eup %2127 }
 0x275   :  { %v246_v43 = vpop.permute.xlu1 %245 }
 0x276   :  { %v248_v44 = vmul.f32 %v2128_v42, %v246_v43  ;;  %v2586_v42 = vld [vmem:[#allocation2 + $0x80] ss:$16 sps:$4 sm:$0xff]   ;;  %v2588_v43 = vld [vmem:[#allocation2 + $0x8c] ss:$16 sps:$4 sm:$0xff]  }
 0x277   :  { %589 = vmatpush1.bf16.msra.mxu0 %v2586_v42 }
 0x278   :  { %v249_v46 = vpack.c.bf16 %v248_v44, %v248_v44  ;;  %v2590_v44 = vld [vmem:[#allocation2 + $0x88] ss:$16 sps:$4 sm:$0xff]  }
 0x27a   :  { %1939 = vmatmul.mubr.msk.bf16.vlgmr.msra.gmra.mrb[0].mxu1 %vm330_vm2, %v249_v46 }
 0x27b   :  { %376 = vmatpush1.bf16.msra.mxu1 %v2516_v45  ;;  %407 = vmatprep.mubr.bf16.mxu1 %v3028_v0 }
 0x27c   :  { %377 = vmatprep.subr.bf16.mxu1 %v2518_v47 }
 0x27f   :  { %378 = vmatpush1.bf16.msra.mxu1 %v2522_v48 }
 0x280   :  { %379 = vmatprep.subr.bf16.mxu1 %v2526_v49 }
 0x283   :  { %380 = vmatpush1.bf16.msra.mxu1 %v2529_v50 }
 0x284   :  { %381 = vmatprep.subr.bf16.mxu1 %v2532_v51 }
 0x287   :  { %382 = vmatpush1.bf16.msra.mxu1 %v2535_v52 }
 0x288   :  { %621 = vmatprep.subr.bf16.mxu1 %v2511_v37 }
 0x28a   :  { %1940 = vmatmul.mubr.msk.bf16.vlgmr.msra.gmra.mrb[4].mxu1 %vm330_vm2, %v249_v46  ;;  %v2596_v46 = vld [vmem:[#allocation2 + $0xac] ss:$16 sps:$4 sm:$0xff]  }
 0x28b   :  { %622 = vmatpush1.bf16.msra.mxu1 %v2516_v45  ;;  %653 = vmatprep.mubr.bf16.mxu1 %v3028_v0 }
 0x28c   :  { %623 = vmatprep.subr.bf16.mxu1 %v2518_v47 }
 0x28f   :  { %624 = vmatpush1.bf16.msra.mxu1 %v2522_v48 }
 0x290   :  { %625 = vmatprep.subr.bf16.mxu1 %v2526_v49 }
 0x293   :  { %626 = vmatpush1.bf16.msra.mxu1 %v2529_v50 }
 0x294   :  { %627 = vmatprep.subr.bf16.mxu1 %v2532_v51 }
 0x297   :  { %628 = vmatpush1.bf16.msra.mxu1 %v2535_v52 }
 0x298   :  { %629 = vmatprep.subr.bf16.mxu1 %v2588_v43 }
 0x29b   :  { %630 = vmatpush1.bf16.msra.mxu1 %v2590_v44 }
 0x29c   :  { %631 = vmatprep.subr.bf16.mxu1 %v2596_v46 }
 0x34d   :  { %v368_v55 = vpop.f32.mrb[0].mxu1 }
 0x34e   :  { %v370_v56 = vpop.f32.mrb[1].mxu1  ;;  %v427_v9 = vadd.f32 %v2568_v8, %v368_v55  ;;  %v2604_v55 = vld [vmem:[#allocation2 + $0xc4] ss:$16 sps:$4 sm:$0xff]  }
 0x34f   :  { %v2554_v57 = vadd.f32 %v2551_v54, %v370_v56  ;;  %v372_v58 = vpop.f32.mrb[2].mxu1  ;;  %v2607_v56 = vld [vmem:[#allocation2 + $0xa8] ss:$16 sps:$4 sm:$0xff]  }
 0x350   :  { %v373_v59 = vpop.f32.mrb[3].mxu1  ;;  %v1941_v11 = vmul.f32 -1.442695, %v427_v9  ;;  %v2091_v58 = vld [vmem:[%s3023_s0 + $0x10] sm:$0xff]   ;;  %632 = vmatpush1.bf16.msra.mxu1 %v2607_v56 }
 0x351   :  { %2129 = vtanh.f32 %v2554_v57  ;;  %v2613_v59 = vld [vmem:[#allocation2 + $0xcc] ss:$16 sps:$4 sm:$0xff]   ;;  %1919 = vmatmul.mubr.msk.bf16.gmra.mrb[8].mxu0 %vm126_vm1, %v2091_v58 }
 0x352   :  { %633 = vmatprep.subr.bf16.mxu1 %v2613_v59  ;;  %208 = vmatprep.mubr.bf16.mxu0 %v3028_v0 }
 0x35b   :  { %v2130_v60 = vpop.eup %2129 }
 0x35c   :  { %444 = vrot.lane.b32.xlu1 %v2130_v60, %s2395_s3  ;;  %v2617_v60 = vld [vmem:[#allocation2 + $0xc0] ss:$16 sps:$4 sm:$0xff]  }
 0x35d   :  { %v409_v63 = vpop.f32.mrb[4].mxu1 }
 0x35e   :  { %v460_v1 = vadd.f32 %v409_v63, %v185_v61  ;;  %v411_v2 = vpop.f32.mrb[5].mxu1  ;;  %v2620_v61 = vld [vmem:[#allocation2 + $0xc8] ss:$16 sps:$4 sm:$0xff]  }
 0x35f   :  { %v2562_v3 = vadd.f32 %v411_v2, %v187_v62  ;;  %v413_v4 = vpop.f32.mrb[6].mxu1  ;;  %v2622_v62 = vld [vmem:[#allocation2 + $0xe4] ss:$16 sps:$4 sm:$0xff]   ;;  %v2631_v2 = vld [vmem:[#allocation2 + $0xe0] ss:$16 sps:$4 sm:$0xff]   ;;  %634 = vmatpush1.bf16.msra.mxu1 %v2620_v61 }
 0x360   :  { %v414_v5 = vpop.f32.mrb[7].mxu1  ;;  %v1943_v13 = vmul.f32 -1.442695, %v460_v1  ;;  %v2626_v1 = vld [vmem:[#allocation2 + $0xec] ss:$16 sps:$4 sm:$0xff]  }
 0x361   :  { %2131 = vtanh.f32 %v2562_v3  ;;  %v2635_v4 = vld [vmem:[#allocation2 + $0xe8] ss:$16 sps:$4 sm:$0xff]   ;;  %635 = vmatprep.subr.bf16.mxu1 %v2626_v1 }
 0x362   :  { %2133 = vpow2.f32 %v1941_v11  ;;  %v2103_v5 = vld [vmem:[%s3023_s0 + $0x18] sm:$0xff]  }
 0x363   :  { %2135 = vpow2.f32 %v1943_v13  ;;  %636 = vmatpush1.bf16.msra.mxu1 %v2635_v4  ;;  %1920 = vmatmul.mubr.msk.bf16.gmra.mrb[12].mxu0 %vm126_vm1, %v2103_v5 }
 0x364   :  { %776 = vmatprep.subr.bf16.mxu1 %v2511_v37  ;;  %612 = vmatprep.mubr.bf16.mxu0 %v3028_v0 }
 0x36b   :  { %v2132_v6 = vpop.eup %2131 }
 0x36c   :  { %477 = vrot.lane.b32.xlu0 %v2132_v6, %s2395_s3  ;;  %v2134_v12 = vpop.eup %2133  ;;  %v1942_v6 = vmul.f32 -1.442695, %v2554_v57 }
 0x36d   :  { %v435_v14 = vadd.f32 1.0, %v2134_v12  ;;  %v2136_v15 = vpop.eup %2135 }
 0x36e   :  { %v468_v21 = vadd.f32 1.0, %v2136_v15 }
 0x36f   :  { %2137 = vrcp.f32 %v435_v14 }
 0x370   :  { %2139 = vrcp.f32 %v468_v21  ;;  %v190_v21 = vpop.f32.mrb[4].mxu0 }
 0x379   :  { %v2138_v16 = vpop.eup %2137 }
 0x37a   :  { %v2140_v7 = vpop.eup %2139  ;;  %v442_v23 = vmul.f32 0.0, %v2138_v16 }
 0x37b   :  { %v475_v35 = vmul.f32 %v2140_v7, %v2507_v36  ;;  %v2594_v36 = vld [vmem:[#allocation2 + $0xa4] ss:$16 sps:$4 sm:$0xff]  }
 0x37c   :  { %590 = vmatprep.subr.bf16.mxu0 %v2594_v36 }
 0x37d   :  { %591 = vmatpush1.bf16.msra.mxu0 %v2600_v53 }
 0x37e   :  { %592 = vmatprep.subr.bf16.mxu0 %v2604_v55 }
 0x381   :  { %593 = vmatpush1.bf16.msra.mxu0 %v2617_v60 }
 0x382   :  { %594 = vmatprep.subr.bf16.mxu0 %v2622_v62 }
 0x385   :  { %595 = vmatpush1.bf16.msra.mxu0 %v2631_v2 }
 0x386   :  { %735 = vmatprep.subr.bf16.mxu0 %v2477_v26 }
 0x3ce   :  { %v445_v19 = vpop.permute.xlu1 %444 }
 0x3cf   :  { %v447_v20 = vmul.f32 %v2138_v16, %v445_v19  ;;  %v1944_v16 = vmul.f32 -1.442695, %v2562_v3 }
 0x3d1   :  { %449 = vrot.lane.b32.xlu1 %v447_v20, %s2395_s3 }
 0x3de   :  { %v478_v17 = vpop.permute.xlu0 %477 }
 0x3df   :  { %v480_v22 = vmul.f32 %v2140_v7, %v478_v17  ;;  %v192_v7 = vpop.f32.mrb[5].mxu0 }
 0x3e0   :  { %v2650_v17 = vpop.f32.mrb[6].mxu0 }
 0x3e1   :  { %482 = vrot.lane.b32.xlu0 %v480_v22, %s2395_s3  ;;  %v2652_v57 = vpop.f32.mrb[7].mxu0 }
 0x443   :  { %v450_v24 = vpop.permute.xlu1 %449 }
 0x444   :  { %v2573_v25 = vadd.f32 %v450_v24, %v442_v23  ;;  %v2654_v23 = vpop.f32.mrb[8].mxu0 }
 0x446   :  { %2141 = vtanh.f32 %v2573_v25 }
 0x450   :  { %v2142_v33 = vpop.eup %2141 }
 0x451   :  { %455 = vrot.lane.b32.xlu1 %v2142_v33, %s2395_s3  ;;  %v2656_v33 = vpop.f32.mrb[9].mxu0 }
 0x453   :  { %v483_v38 = vpop.permute.xlu0 %482 }
 0x454   :  { %v2578_v39 = vadd.f32 %v483_v38, %v475_v35  ;;  %v2658_v38 = vpop.f32.mrb[10].mxu0 }
 0x455   :  { %v2660_v3 = vpop.f32.mrb[11].mxu0 }
 0x456   :  { %2143 = vtanh.f32 %v2578_v39  ;;  %v2663_v5 = vpop.f32.mrb[12].mxu0 }
 0x457   :  { %2145 = vpow2.f32 %v1942_v6  ;;  %v2665_v6 = vpop.f32.mrb[13].mxu0 }
 0x460   :  { %v2144_v63 = vpop.eup %2143 }
 0x461   :  { %488 = vrot.lane.b32.xlu0 %v2144_v63, %s2395_s3  ;;  %v2146_v9 = vpop.eup %2145 }
 0x462   :  { %v436_v11 = vadd.f32 1.0, %v2146_v9  ;;  %v2667_v9 = vpop.f32.mrb[14].mxu0 }
 0x464   :  { %2147 = vrcp.f32 %v436_v11  ;;  %v2671_v11 = vpop.f32.mrb[15].mxu0 }
 0x465   :  { %2149 = vpow2.f32 %v1944_v16  ;;  %3030 = vst [vmem:[#allocation8_spill] sm:$0xff] %v2671_v11 }
 0x46e   :  { %v2148_v12 = vpop.eup %2147 }
 0x46f   :  { %v2150_v19 = vpop.eup %2149 }
 0x470   :  { %v469_v20 = vadd.f32 1.0, %v2150_v19 }
 0x472   :  { %2151 = vrcp.f32 %v469_v20 }
 0x47c   :  { %v2152_v24 = vpop.eup %2151 }
 0x4c3   :  { %v456_v13 = vpop.permute.xlu1 %455 }
 0x4c4   :  { %v458_v14 = vmul.f32 %v2148_v12, %v456_v13  ;;  %v191_v12 = vadd.f32 %v190_v21, %v2473_v18  ;;  %v193_v13 = vadd.f32 %v192_v7, %v2462_v10 }
 0x4c6   :  { %v459_v15 = vpack.c.bf16 %v458_v14, %v458_v14 }
 0x4c8   :  { %494 = vrot.lane.b32.xlu1 %v459_v15, %s2395_s3 }
 0x4d3   :  { %v489_v22 = vpop.permute.xlu0 %488 }
 0x4d4   :  { %v491_v35 = vmul.f32 %v2152_v24, %v489_v22 }
 0x4d6   :  { %v492_v40 = vpack.c.bf16 %v491_v35, %v491_v35 }
 0x53a   :  { %v495_v58 = vpop.permute.xlu1 %494 }
 0x53b   :  { %v498_v63 = vsel %vm330_vm2, %v492_v40, %v495_v58 }
 0x53c   :  { %613 = vmatmul.mubr.bf16.vlgmr.msra.gmra.mrb[16].mxu0 %v498_v63  ;;  %654 = vmatmul.mubr.bf16.vlgmr.msra.gmra.mrb[8].mxu1 %v498_v63 }
 0x53d   :  { %736 = vmatpush1.bf16.msra.mxu0 %v2479_v27  ;;  %777 = vmatpush1.bf16.msra.mxu1 %v2516_v45 }
 0x53e   :  { %737 = vmatprep.subr.bf16.mxu0 %v2481_v28  ;;  %778 = vmatprep.subr.bf16.mxu1 %v2518_v47 }
 0x53f   :  { %767 = vmatprep.mubr.bf16.mxu0 %v3028_v0  ;;  %808 = vmatprep.mubr.bf16.mxu1 %v3028_v0 }
 0x541   :  { %738 = vmatpush1.bf16.msra.mxu0 %v2486_v29  ;;  %779 = vmatpush1.bf16.msra.mxu1 %v2522_v48 }
 0x542   :  { %739 = vmatprep.subr.bf16.mxu0 %v2490_v30  ;;  %780 = vmatprep.subr.bf16.mxu1 %v2526_v49 }
 0x545   :  { %740 = vmatpush1.bf16.msra.mxu0 %v2494_v31  ;;  %781 = vmatpush1.bf16.msra.mxu1 %v2529_v50 }
 0x546   :  { %741 = vmatprep.subr.bf16.mxu0 %v2501_v32  ;;  %782 = vmatprep.subr.bf16.mxu1 %v2532_v51 }
 0x549   :  { %742 = vmatpush1.bf16.msra.mxu0 %v2503_v34  ;;  %783 = vmatpush1.bf16.msra.mxu1 %v2535_v52 }
 0x54a   :  { %743 = vmatprep.subr.bf16.mxu0 %v2584_v41  ;;  %784 = vmatprep.subr.bf16.mxu1 %v2588_v43 }
 0x54d   :  { %744 = vmatpush1.bf16.msra.mxu0 %v2586_v42  ;;  %785 = vmatpush1.bf16.msra.mxu1 %v2590_v44 }
 0x54e   :  { %745 = vmatprep.subr.bf16.mxu0 %v2594_v36  ;;  %786 = vmatprep.subr.bf16.mxu1 %v2596_v46 }
 0x551   :  { %746 = vmatpush1.bf16.msra.mxu0 %v2600_v53  ;;  %787 = vmatpush1.bf16.msra.mxu1 %v2607_v56 }
 0x552   :  { %747 = vmatprep.subr.bf16.mxu0 %v2604_v55  ;;  %788 = vmatprep.subr.bf16.mxu1 %v2613_v59 }
 0x555   :  { %748 = vmatpush1.bf16.msra.mxu0 %v2617_v60  ;;  %789 = vmatpush1.bf16.msra.mxu1 %v2620_v61 }
 0x556   :  { %749 = vmatprep.subr.bf16.mxu0 %v2622_v62  ;;  %790 = vmatprep.subr.bf16.mxu1 %v2626_v1 }
 0x559   :  { %750 = vmatpush1.bf16.msra.mxu0 %v2631_v2  ;;  %791 = vmatpush1.bf16.msra.mxu1 %v2635_v4 }
 0x55a   :  { %890 = vmatprep.subr.bf16.mxu0 %v2477_v26  ;;  %931 = vmatprep.subr.bf16.mxu1 %v2511_v37 }
 0x60f   :  { %v614_v14 = vpop.f32.mrb[16].mxu0  ;;  %v655_v15 = vpop.f32.mrb[8].mxu1 }
 0x610   :  { %v695_v16 = vadd.f32 %v655_v15, %v191_v12  ;;  %v616_v19 = vpop.f32.mrb[17].mxu0  ;;  %v657_v20 = vpop.f32.mrb[9].mxu1  ;;  %v662_v7 = vadd.f32 %v614_v14, %v2568_v8 }
 0x611   :  { %v663_v22 = vadd.f32 %v616_v19, %v2551_v54  ;;  %v696_v24 = vadd.f32 %v657_v20, %v193_v13  ;;  %v618_v35 = vpop.f32.mrb[18].mxu0  ;;  %v659_v40 = vpop.f32.mrb[10].mxu1 }
 0x612   :  { %v619_v58 = vpop.f32.mrb[19].mxu0  ;;  %v660_v63 = vpop.f32.mrb[11].mxu1  ;;  %v1961_v12 = vmul.f32 -1.442695, %v662_v7  ;;  %v1963_v15 = vmul.f32 -1.442695, %v695_v16 }
 0x613   :  { %2153 = vtanh.f32 %v663_v22 }
 0x614   :  { %2155 = vtanh.f32 %v696_v24 }
 0x615   :  { %2157 = vpow2.f32 %v1961_v12 }
 0x616   :  { %2159 = vpow2.f32 %v1963_v15 }
 0x61d   :  { %v2154_v0 = vpop.eup %2153 }
 0x61e   :  { %679 = vrot.lane.b32.xlu0 %v2154_v0, %s2395_s3  ;;  %v2156_v21 = vpop.eup %2155 }
 0x61f   :  { %712 = vrot.lane.b32.xlu1 %v2156_v21, %s2395_s3  ;;  %v2158_v19 = vpop.eup %2157 }
 0x620   :  { %v670_v13 = vadd.f32 1.0, %v2158_v19  ;;  %v2160_v20 = vpop.eup %2159 }
 0x621   :  { %v703_v35 = vadd.f32 1.0, %v2160_v20  ;;  %v1962_v20 = vmul.f32 -1.442695, %v663_v22 }
 0x622   :  { %2161 = vrcp.f32 %v670_v13 }
 0x623   :  { %2163 = vrcp.f32 %v703_v35 }
 0x62c   :  { %v2162_v40 = vpop.eup %2161 }
 0x62d   :  { %v2164_v0 = vpop.eup %2163  ;;  %v677_v14 = vmul.f32 %v2162_v40, %v2573_v25 }
 0x62e   :  { %v710_v12 = vmul.f32 %v2164_v0, %v2578_v39 }
 0x690   :  { %v680_v58 = vpop.permute.xlu0 %679 }
 0x691   :  { %v682_v63 = vmul.f32 %v2162_v40, %v680_v58  ;;  %v713_v11 = vpop.permute.xlu1 %712 }
 0x692   :  { %v715_v21 = vmul.f32 %v2164_v0, %v713_v11  ;;  %v1964_v0 = vmul.f32 -1.442695, %v696_v24  ;;  %v3031_v24 = vmov 0  }
 0x693   :  { %684 = vrot.lane.b32.xlu0 %v682_v63, %s2395_s3 }
 0x694   :  { %717 = vrot.lane.b32.xlu1 %v715_v21, %s2395_s3 }
 0x705   :  { %v685_v16 = vpop.permute.xlu0 %684 }
 0x706   :  { %v2714_v7 = vadd.f32 %v685_v16, %v677_v14  ;;  %v718_v15 = vpop.permute.xlu1 %717 }
 0x707   :  { %v2718_v19 = vadd.f32 %v718_v15, %v710_v12 }
 0x708   :  { %2165 = vtanh.f32 %v2714_v7 }
 0x709   :  { %2167 = vtanh.f32 %v2718_v19 }
 0x70a   :  { %2169 = vpow2.f32 %v1962_v20  ;;  %v195_v20 = vadd.f32 %v2650_v17, %v2473_v18 }
 0x712   :  { %v2166_v13 = vpop.eup %2165 }
 0x713   :  { %690 = vrot.lane.b32.xlu0 %v2166_v13, %s2395_s3  ;;  %v2168_v11 = vpop.eup %2167 }
 0x714   :  { %723 = vrot.lane.b32.xlu1 %v2168_v11, %s2395_s3  ;;  %v2170_v25 = vpop.eup %2169 }
 0x715   :  { %v671_v35 = vadd.f32 1.0, %v2170_v25  ;;  %v197_v25 = vadd.f32 %v2652_v57, %v2462_v10 }
 0x717   :  { %2171 = vrcp.f32 %v671_v35 }
 0x718   :  { %2173 = vpow2.f32 %v1964_v0 }
 0x721   :  { %v2172_v40 = vpop.eup %2171 }
 0x722   :  { %v2174_v21 = vpop.eup %2173 }
 0x723   :  { %v704_v14 = vadd.f32 1.0, %v2174_v21 }
 0x725   :  { %2175 = vrcp.f32 %v704_v14 }
 0x72f   :  { %v2176_v12 = vpop.eup %2175 }
 0x785   :  { %v691_v58 = vpop.permute.xlu0 %690 }
 0x786   :  { %v693_v63 = vmul.f32 %v2172_v40, %v691_v58  ;;  %v724_v16 = vpop.permute.xlu1 %723 }
 0x787   :  { %v726_v15 = vmul.f32 %v2176_v12, %v724_v16 }
 0x788   :  { %v694_v39 = vpack.c.bf16 %v693_v63, %v693_v63 }
 0x789   :  { %v727_v13 = vpack.c.bf16 %v726_v15, %v726_v15 }
 0x78a   :  { %729 = vrot.lane.b32.xlu0 %v694_v39, %s2395_s3 }
 0x7fc   :  { %v730_v22 = vpop.permute.xlu0 %729 }
 0x7fd   :  { %v733_v11 = vsel %vm330_vm2, %v727_v13, %v730_v22 }
 0x7fe   :  { %768 = vmatmul.mubr.bf16.vlgmr.msra.gmra.mrb[20].mxu0 %v733_v11  ;;  %809 = vmatmul.mubr.bf16.vlgmr.msra.gmra.mrb[12].mxu1 %v733_v11 }
 0x7ff   :  { %891 = vmatpush1.bf16.msra.mxu0 %v2479_v27  ;;  %932 = vmatpush1.bf16.msra.mxu1 %v2516_v45 }
 0x800   :  { %892 = vmatprep.subr.bf16.mxu0 %v2481_v28  ;;  %933 = vmatprep.subr.bf16.mxu1 %v2518_v47 }
 0x801   :  { %922 = vmatprep.mubr.bf16.mxu0 %v3031_v24  ;;  %963 = vmatprep.mubr.bf16.mxu1 %v3031_v24 }
 0x803   :  { %893 = vmatpush1.bf16.msra.mxu0 %v2486_v29  ;;  %934 = vmatpush1.bf16.msra.mxu1 %v2522_v48 }
 0x804   :  { %894 = vmatprep.subr.bf16.mxu0 %v2490_v30  ;;  %935 = vmatprep.subr.bf16.mxu1 %v2526_v49 }
 0x807   :  { %895 = vmatpush1.bf16.msra.mxu0 %v2494_v31  ;;  %936 = vmatpush1.bf16.msra.mxu1 %v2529_v50 }
 0x808   :  { %896 = vmatprep.subr.bf16.mxu0 %v2501_v32  ;;  %937 = vmatprep.subr.bf16.mxu1 %v2532_v51 }
 0x80b   :  { %897 = vmatpush1.bf16.msra.mxu0 %v2503_v34  ;;  %938 = vmatpush1.bf16.msra.mxu1 %v2535_v52 }
 0x80c   :  { %898 = vmatprep.subr.bf16.mxu0 %v2584_v41  ;;  %939 = vmatprep.subr.bf16.mxu1 %v2588_v43 }
 0x80f   :  { %899 = vmatpush1.bf16.msra.mxu0 %v2586_v42  ;;  %940 = vmatpush1.bf16.msra.mxu1 %v2590_v44 }
 0x810   :  { %900 = vmatprep.subr.bf16.mxu0 %v2594_v36  ;;  %941 = vmatprep.subr.bf16.mxu1 %v2596_v46 }
 0x813   :  { %901 = vmatpush1.bf16.msra.mxu0 %v2600_v53  ;;  %942 = vmatpush1.bf16.msra.mxu1 %v2607_v56 }
 0x814   :  { %902 = vmatprep.subr.bf16.mxu0 %v2604_v55  ;;  %943 = vmatprep.subr.bf16.mxu1 %v2613_v59 }
 0x817   :  { %903 = vmatpush1.bf16.msra.mxu0 %v2617_v60  ;;  %944 = vmatpush1.bf16.msra.mxu1 %v2620_v61 }
 0x818   :  { %904 = vmatprep.subr.bf16.mxu0 %v2622_v62  ;;  %945 = vmatprep.subr.bf16.mxu1 %v2626_v1 }
 0x81b   :  { %905 = vmatpush1.bf16.msra.mxu0 %v2631_v2  ;;  %946 = vmatpush1.bf16.msra.mxu1 %v2635_v4 }
 0x81c   :  { %1045 = vmatprep.subr.bf16.mxu0 %v2477_v26  ;;  %1086 = vmatprep.subr.bf16.mxu1 %v2511_v37 }
 0x8d1   :  { %v769_v35 = vpop.f32.mrb[20].mxu0  ;;  %v810_v40 = vpop.f32.mrb[12].mxu1 }
 0x8d2   :  { %v850_v58 = vadd.f32 %v810_v40, %v195_v20  ;;  %v771_v63 = vpop.f32.mrb[21].mxu0  ;;  %v812_v39 = vpop.f32.mrb[13].mxu1  ;;  %v817_v57 = vadd.f32 %v769_v35, %v2568_v8 }
 0x8d3   :  { %v818_v0 = vadd.f32 %v771_v63, %v2551_v54  ;;  %v851_v21 = vadd.f32 %v812_v39, %v197_v25  ;;  %v773_v14 = vpop.f32.mrb[22].mxu0  ;;  %v814_v16 = vpop.f32.mrb[14].mxu1 }
 0x8d4   :  { %v774_v12 = vpop.f32.mrb[23].mxu0  ;;  %v815_v15 = vpop.f32.mrb[15].mxu1  ;;  %v1965_v22 = vmul.f32 -1.442695, %v817_v57  ;;  %v1967_v11 = vmul.f32 -1.442695, %v850_v58 }
 0x8d5   :  { %2177 = vtanh.f32 %v818_v0 }
 0x8d6   :  { %2179 = vtanh.f32 %v851_v21 }
 0x8d7   :  { %2181 = vpow2.f32 %v1965_v22 }
 0x8d8   :  { %2183 = vpow2.f32 %v1967_v11 }
 0x8df   :  { %v2178_v13 = vpop.eup %2177 }
 0x8e0   :  { %834 = vrot.lane.b32.xlu1 %v2178_v13, %s2395_s3  ;;  %v2180_v17 = vpop.eup %2179 }
 0x8e1   :  { %867 = vrot.lane.b32.xlu0 %v2180_v17, %s2395_s3  ;;  %v2182_v20 = vpop.eup %2181 }
 0x8e2   :  { %v825_v25 = vadd.f32 1.0, %v2182_v20  ;;  %v2184_v40 = vpop.eup %2183 }
 0x8e3   :  { %v858_v63 = vadd.f32 1.0, %v2184_v40  ;;  %v1966_v40 = vmul.f32 -1.442695, %v818_v0 }
 0x8e4   :  { %2185 = vrcp.f32 %v825_v25 }
 0x8e5   :  { %2187 = vrcp.f32 %v858_v63 }
 0x8ee   :  { %v2186_v39 = vpop.eup %2185 }
 0x8ef   :  { %v2188_v12 = vpop.eup %2187  ;;  %v832_v35 = vmul.f32 %v2186_v39, %v2714_v7 }
 0x8f0   :  { %v865_v57 = vmul.f32 %v2188_v12, %v2718_v19 }
 0x952   :  { %v835_v14 = vpop.permute.xlu1 %834 }
 0x953   :  { %v837_v16 = vmul.f32 %v2186_v39, %v835_v14  ;;  %v868_v15 = vpop.permute.xlu0 %867 }
 0x954   :  { %v870_v13 = vmul.f32 %v2188_v12, %v868_v15  ;;  %v1968_v12 = vmul.f32 -1.442695, %v851_v21 }
 0x955   :  { %839 = vrot.lane.b32.xlu1 %v837_v16, %s2395_s3 }
 0x956   :  { %872 = vrot.lane.b32.xlu0 %v870_v13, %s2395_s3 }
 0x9c7   :  { %v840_v58 = vpop.permute.xlu1 %839 }
 0x9c8   :  { %v2770_v17 = vadd.f32 %v840_v58, %v832_v35  ;;  %v873_v22 = vpop.permute.xlu0 %872 }
 0x9c9   :  { %v2774_v11 = vadd.f32 %v873_v22, %v865_v57 }
 0x9ca   :  { %2189 = vtanh.f32 %v2770_v17 }
 0x9cb   :  { %2191 = vtanh.f32 %v2774_v11 }
 0x9cc   :  { %2193 = vpow2.f32 %v1966_v40 }
 0x9d4   :  { %v2190_v20 = vpop.eup %2189 }
 0x9d5   :  { %845 = vrot.lane.b32.xlu1 %v2190_v20, %s2395_s3  ;;  %v2192_v25 = vpop.eup %2191 }
 0x9d6   :  { %878 = vrot.lane.b32.xlu0 %v2192_v25, %s2395_s3  ;;  %v2194_v7 = vpop.eup %2193 }
 0x9d7   :  { %v826_v63 = vadd.f32 1.0, %v2194_v7 }
 0x9d9   :  { %2195 = vrcp.f32 %v826_v63 }
 0x9da   :  { %2197 = vpow2.f32 %v1968_v12 }
 0x9e3   :  { %v2196_v39 = vpop.eup %2195 }
 0x9e4   :  { %v2198_v15 = vpop.eup %2197 }
 0x9e5   :  { %v859_v13 = vadd.f32 1.0, %v2198_v15 }
 0x9e7   :  { %2199 = vrcp.f32 %v859_v13 }
 0x9f1   :  { %v2200_v58 = vpop.eup %2199 }
 0xa47   :  { %v846_v14 = vpop.permute.xlu1 %845 }
 0xa48   :  { %v848_v16 = vmul.f32 %v2196_v39, %v846_v14  ;;  %v879_v35 = vpop.permute.xlu0 %878 }
 0xa49   :  { %v881_v57 = vmul.f32 %v2200_v58, %v879_v35 }
 0xa4a   :  { %v849_v19 = vpack.c.bf16 %v848_v16, %v848_v16 }
 0xa4b   :  { %v882_v22 = vpack.c.bf16 %v881_v57, %v881_v57 }
 0xa4c   :  { %884 = vrot.lane.b32.xlu1 %v849_v19, %s2395_s3 }
 0xabe   :  { %v885_v0 = vpop.permute.xlu1 %884 }
 0xabf   :  { %v888_v20 = vsel %vm330_vm2, %v882_v22, %v885_v0 }
 0xac0   :  { %923 = vmatmul.mubr.bf16.vlgmr.msra.gmra.mrb[24].mxu0 %v888_v20  ;;  %964 = vmatmul.mubr.bf16.vlgmr.msra.gmra.mrb[16].mxu1 %v888_v20 }
 0xac1   :  { %1046 = vmatpush1.bf16.msra.mxu0 %v2479_v27  ;;  %1087 = vmatpush1.bf16.msra.mxu1 %v2516_v45  ;;  %v201_v27 = vadd.f32 %v2654_v23, %v2473_v18 }
 0xac2   :  { %1047 = vmatprep.subr.bf16.mxu0 %v2481_v28  ;;  %1088 = vmatprep.subr.bf16.mxu1 %v2518_v47  ;;  %v203_v28 = vadd.f32 %v2656_v33, %v2462_v10 }
 0xac3   :  { %1077 = vmatprep.mubr.bf16.mxu0 %v3031_v24  ;;  %1118 = vmatprep.mubr.bf16.mxu1 %v3031_v24 }
 0xac5   :  { %1048 = vmatpush1.bf16.msra.mxu0 %v2486_v29  ;;  %1089 = vmatpush1.bf16.msra.mxu1 %v2522_v48 }
 0xac6   :  { %1049 = vmatprep.subr.bf16.mxu0 %v2490_v30  ;;  %1090 = vmatprep.subr.bf16.mxu1 %v2526_v49 }
 0xac9   :  { %1050 = vmatpush1.bf16.msra.mxu0 %v2494_v31  ;;  %1091 = vmatpush1.bf16.msra.mxu1 %v2529_v50 }
 0xaca   :  { %1051 = vmatprep.subr.bf16.mxu0 %v2501_v32  ;;  %1092 = vmatprep.subr.bf16.mxu1 %v2532_v51 }
 0xacd   :  { %1052 = vmatpush1.bf16.msra.mxu0 %v2503_v34  ;;  %1093 = vmatpush1.bf16.msra.mxu1 %v2535_v52 }
 0xace   :  { %1053 = vmatprep.subr.bf16.mxu0 %v2584_v41  ;;  %1094 = vmatprep.subr.bf16.mxu1 %v2588_v43 }
 0xad1   :  { %1054 = vmatpush1.bf16.msra.mxu0 %v2586_v42  ;;  %1095 = vmatpush1.bf16.msra.mxu1 %v2590_v44 }
 0xad2   :  { %1055 = vmatprep.subr.bf16.mxu0 %v2594_v36  ;;  %1096 = vmatprep.subr.bf16.mxu1 %v2596_v46 }
 0xad5   :  { %1056 = vmatpush1.bf16.msra.mxu0 %v2600_v53  ;;  %1097 = vmatpush1.bf16.msra.mxu1 %v2607_v56 }
 0xad6   :  { %1057 = vmatprep.subr.bf16.mxu0 %v2604_v55  ;;  %1098 = vmatprep.subr.bf16.mxu1 %v2613_v59 }
 0xad9   :  { %1058 = vmatpush1.bf16.msra.mxu0 %v2617_v60  ;;  %1099 = vmatpush1.bf16.msra.mxu1 %v2620_v61 }
 0xada   :  { %1059 = vmatprep.subr.bf16.mxu0 %v2622_v62  ;;  %1100 = vmatprep.subr.bf16.mxu1 %v2626_v1 }
 0xadd   :  { %1060 = vmatpush1.bf16.msra.mxu0 %v2631_v2  ;;  %1101 = vmatpush1.bf16.msra.mxu1 %v2635_v4 }
 0xade   :  { %1200 = vmatprep.subr.bf16.mxu0 %v2477_v26  ;;  %1241 = vmatprep.subr.bf16.mxu1 %v2511_v37 }
 0xb93   :  { %v924_v29 = vpop.f32.mrb[24].mxu0  ;;  %v965_v30 = vpop.f32.mrb[16].mxu1 }
 0xb94   :  { %v1005_v31 = vadd.f32 %v965_v30, %v201_v27  ;;  %v926_v32 = vpop.f32.mrb[25].mxu0  ;;  %v967_v34 = vpop.f32.mrb[17].mxu1  ;;  %v972_v33 = vadd.f32 %v924_v29, %v2568_v8 }
 0xb95   :  { %v973_v21 = vadd.f32 %v926_v32, %v2551_v54  ;;  %v1006_v25 = vadd.f32 %v967_v34, %v203_v28  ;;  %v928_v40 = vpop.f32.mrb[26].mxu0  ;;  %v969_v7 = vpop.f32.mrb[18].mxu1 }
 0xb96   :  { %v929_v63 = vpop.f32.mrb[27].mxu0  ;;  %v970_v26 = vpop.f32.mrb[19].mxu1  ;;  %v1969_v39 = vmul.f32 -1.442695, %v972_v33  ;;  %v1971_v14 = vmul.f32 -1.442695, %v1005_v31 }
 0xb97   :  { %2201 = vtanh.f32 %v973_v21  ;;  %v1970_v40 = vmul.f32 -1.442695, %v973_v21 }
 0xb98   :  { %2203 = vtanh.f32 %v1006_v25 }
 0xb99   :  { %2205 = vpow2.f32 %v1969_v39 }
 0xb9a   :  { %2207 = vpow2.f32 %v1971_v14 }
 0xba1   :  { %v2202_v37 = vpop.eup %2201 }
 0xba2   :  { %989 = vrot.lane.b32.xlu0 %v2202_v37, %s2395_s3  ;;  %v2204_v23 = vpop.eup %2203 }
 0xba3   :  { %1022 = vrot.lane.b32.xlu1 %v2204_v23, %s2395_s3  ;;  %v2206_v16 = vpop.eup %2205  ;;  %v1972_v23 = vmul.f32 -1.442695, %v1006_v25  ;;  %v2841_v25 = vld [vmem:[#allocation2 + $0x24] ss:$16 sps:$4 sm:$0xff]  }
 0xba4   :  { %v980_v19 = vadd.f32 1.0, %v2206_v16  ;;  %v2208_v12 = vpop.eup %2207 }
 0xba5   :  { %v1013_v15 = vadd.f32 1.0, %v2208_v12 }
 0xba6   :  { %2209 = vrcp.f32 %v980_v19 }
 0xba7   :  { %2211 = vrcp.f32 %v1013_v15 }
 0xbb0   :  { %v2210_v13 = vpop.eup %2209 }
 0xbb1   :  { %v2212_v57 = vpop.eup %2211  ;;  %v987_v20 = vmul.f32 %v2210_v13, %v2770_v17 }
 0xbb2   :  { %v1020_v29 = vmul.f32 %v2212_v57, %v2774_v11 }
 0xc14   :  { %v990_v35 = vpop.permute.xlu0 %989 }
 0xc15   :  { %v992_v58 = vmul.f32 %v2210_v13, %v990_v35  ;;  %v1023_v22 = vpop.permute.xlu1 %1022  ;;  %v2837_v13 = vld [vmem:[#allocation2] ss:$16 sps:$4 sm:$0xff]  }
 0xc16   :  { %v1025_v0 = vmul.f32 %v2212_v57, %v1023_v22  ;;  %v2847_v35 = vld [vmem:[#allocation2 + $0x20] ss:$16 sps:$4 sm:$0xff]  }
 0xc17   :  { %994 = vrot.lane.b32.xlu0 %v992_v58, %s2395_s3  ;;  %v2851_v58 = vld [vmem:[#allocation2 + $0x44] ss:$16 sps:$4 sm:$0xff]   ;;  %v2863_v57 = vld [vmem:[#allocation2 + $0x60] ss:$16 sps:$4 sm:$0xff]  }
 0xc18   :  { %1027 = vrot.lane.b32.xlu1 %v1025_v0, %s2395_s3 }
 0xc89   :  { %v995_v27 = vpop.permute.xlu0 %994 }
 0xc8a   :  { %v2826_v28 = vadd.f32 %v995_v27, %v987_v20  ;;  %v1028_v30 = vpop.permute.xlu1 %1027 }
 0xc8b   :  { %v2830_v31 = vadd.f32 %v1028_v30, %v1020_v29 }
 0xc8c   :  { %2213 = vtanh.f32 %v2826_v28 }
 0xc8d   :  { %2215 = vtanh.f32 %v2830_v31 }
 0xc8e   :  { %2217 = vpow2.f32 %v1970_v40 }
 0xc96   :  { %v2214_v32 = vpop.eup %2213 }
 0xc97   :  { %1000 = vrot.lane.b32.xlu0 %v2214_v32, %s2395_s3  ;;  %v2216_v34 = vpop.eup %2215 }
 0xc98   :  { %1033 = vrot.lane.b32.xlu1 %v2216_v34, %s2395_s3  ;;  %v2218_v17 = vpop.eup %2217 }
 0xc99   :  { %v981_v7 = vadd.f32 1.0, %v2218_v17 }
 0xc9b   :  { %2219 = vrcp.f32 %v981_v7 }
 0xc9c   :  { %2221 = vpow2.f32 %v1972_v23 }
 0xca5   :  { %v2220_v63 = vpop.eup %2219 }
 0xca6   :  { %v2222_v33 = vpop.eup %2221 }
 0xca7   :  { %v1014_v39 = vadd.f32 1.0, %v2222_v33 }
 0xca9   :  { %2223 = vrcp.f32 %v1014_v39 }
 0xcb3   :  { %v2224_v16 = vpop.eup %2223 }
 0xd09   :  { %v1001_v26 = vpop.permute.xlu0 %1000 }
 0xd0a   :  { %v1003_v37 = vmul.f32 %v2220_v63, %v1001_v26  ;;  %v1034_v14 = vpop.permute.xlu1 %1033 }
 0xd0b   :  { %v1036_v19 = vmul.f32 %v2224_v16, %v1034_v14 }
 0xd0c   :  { %v1004_v11 = vpack.c.bf16 %v1003_v37, %v1003_v37 }
 0xd0d   :  { %v1037_v12 = vpack.c.bf16 %v1036_v19, %v1036_v19 }
 0xd0e   :  { %1039 = vrot.lane.b32.xlu0 %v1004_v11, %s2395_s3 }
 0xd80   :  { %v1040_v21 = vpop.permute.xlu0 %1039 }
 0xd81   :  { %v1043_v15 = vsel %vm330_vm2, %v1037_v12, %v1040_v21 }
 0xd82   :  { %1078 = vmatmul.mubr.bf16.vlgmr.msra.gmra.mrb[28].mxu0 %v1043_v15  ;;  %1119 = vmatmul.mubr.bf16.vlgmr.msra.gmra.mrb[20].mxu1 %v1043_v15 }
 0xd83   :  { %1201 = vmatpush1.bf16.msra.mxu0 %v2837_v13  ;;  %1242 = vmatpush1.bf16.msra.mxu1 %v2516_v45  ;;  %v2855_v45 = vld [vmem:[#allocation2 + $0x40] ss:$16 sps:$4 sm:$0xff]  }
 0xd84   :  { %1202 = vmatprep.subr.bf16.mxu0 %v2841_v25  ;;  %1243 = vmatprep.subr.bf16.mxu1 %v2518_v47  ;;  %v2859_v47 = vld [vmem:[#allocation2 + $0x64] ss:$16 sps:$4 sm:$0xff]  }
 0xd85   :  { %1232 = vmatprep.mubr.bf16.mxu0 %v3031_v24  ;;  %1273 = vmatprep.mubr.bf16.mxu1 %v3031_v24 }
 0xd87   :  { %1203 = vmatpush1.bf16.msra.mxu0 %v2847_v35  ;;  %1244 = vmatpush1.bf16.msra.mxu1 %v2522_v48  ;;  %v2883_v48 = vld [vmem:[#allocation2 + $0x4] ss:$16 sps:$4 sm:$0xff]  }
 0xd88   :  { %1204 = vmatprep.subr.bf16.mxu0 %v2851_v58  ;;  %1245 = vmatprep.subr.bf16.mxu1 %v2526_v49  ;;  %v2321_v49 = vld [vmem:[#allocation2 + $0xc] ss:$16 sps:$4 sm:$0xff]  }
 0xd8b   :  { %1205 = vmatpush1.bf16.msra.mxu0 %v2855_v45  ;;  %1246 = vmatpush1.bf16.msra.mxu1 %v2529_v50  ;;  %v205_v50 = vadd.f32 %v2658_v38, %v2473_v18 }
 0xd8c   :  { %1206 = vmatprep.subr.bf16.mxu0 %v2859_v47  ;;  %1247 = vmatprep.subr.bf16.mxu1 %v2532_v51  ;;  %v207_v51 = vadd.f32 %v2660_v3, %v2462_v10 }
 0xd8f   :  { %1207 = vmatpush1.bf16.msra.mxu0 %v2863_v57  ;;  %1248 = vmatpush1.bf16.msra.mxu1 %v2535_v52 }
 0xd90   :  { %1208 = vmatprep.subr.bf16.mxu0 %v2584_v41  ;;  %1249 = vmatprep.subr.bf16.mxu1 %v2588_v43 }
 0xd93   :  { %1209 = vmatpush1.bf16.msra.mxu0 %v2586_v42  ;;  %1250 = vmatpush1.bf16.msra.mxu1 %v2590_v44 }
 0xd94   :  { %1210 = vmatprep.subr.bf16.mxu0 %v2594_v36  ;;  %1251 = vmatprep.subr.bf16.mxu1 %v2596_v46 }
 0xd97   :  { %1211 = vmatpush1.bf16.msra.mxu0 %v2600_v53  ;;  %1252 = vmatpush1.bf16.msra.mxu1 %v2607_v56 }
 0xd98   :  { %1212 = vmatprep.subr.bf16.mxu0 %v2604_v55  ;;  %1253 = vmatprep.subr.bf16.mxu1 %v2613_v59 }
 0xd9b   :  { %1213 = vmatpush1.bf16.msra.mxu0 %v2617_v60  ;;  %1254 = vmatpush1.bf16.msra.mxu1 %v2620_v61 }
 0xd9c   :  { %1214 = vmatprep.subr.bf16.mxu0 %v2622_v62  ;;  %1255 = vmatprep.subr.bf16.mxu1 %v2626_v1 }
 0xd9f   :  { %1215 = vmatpush1.bf16.msra.mxu0 %v2631_v2  ;;  %1256 = vmatpush1.bf16.msra.mxu1 %v2635_v4 }
 0xda0   :  { %1355 = vmatprep.subr.bf16.mxu0 %v2883_v48  ;;  %1396 = vmatprep.subr.bf16.mxu1 %v2321_v49 }
 0xe55   :  { %v1079_v52 = vpop.f32.mrb[28].mxu0  ;;  %v1120_v41 = vpop.f32.mrb[20].mxu1 }
 0xe56   :  { %v1160_v42 = vadd.f32 %v1120_v41, %v205_v50  ;;  %v1081_v43 = vpop.f32.mrb[29].mxu0  ;;  %v1122_v44 = vpop.f32.mrb[21].mxu1  ;;  %v1127_v3 = vadd.f32 %v1079_v52, %v2568_v8 }
 0xe57   :  { %v1128_v36 = vadd.f32 %v1081_v43, %v2551_v54  ;;  %v1161_v46 = vadd.f32 %v1122_v44, %v207_v51  ;;  %v1083_v53 = vpop.f32.mrb[30].mxu0  ;;  %v1124_v55 = vpop.f32.mrb[22].mxu1 }
 0xe58   :  { %v1084_v56 = vpop.f32.mrb[31].mxu0  ;;  %v1125_v59 = vpop.f32.mrb[23].mxu1  ;;  %v1973_v22 = vmul.f32 -1.442695, %v1127_v3  ;;  %v1975_v0 = vmul.f32 -1.442695, %v1160_v42 }
 0xe59   :  { %2225 = vtanh.f32 %v1128_v36  ;;  %v1974_v19 = vmul.f32 -1.442695, %v1128_v36  ;;  %v1976_v50 = vmul.f32 -1.442695, %v1161_v46  ;;  %v2322_v55 = vld [vmem:[#allocation2 + $0x8] ss:$16 sps:$4 sm:$0xff]  }
 0xe5a   :  { %2227 = vtanh.f32 %v1161_v46  ;;  %v2323_v46 = vld [vmem:[#allocation2 + $0x2c] ss:$16 sps:$4 sm:$0xff]   ;;  %v2324_v56 = vld [vmem:[#allocation2 + $0x28] ss:$16 sps:$4 sm:$0xff]  }
 0xe5b   :  { %2229 = vpow2.f32 %v1973_v22  ;;  %v2325_v59 = vld [vmem:[#allocation2 + $0x4c] ss:$16 sps:$4 sm:$0xff]   ;;  %v2328_v3 = vld [vmem:[#allocation2 + $0x68] ss:$16 sps:$4 sm:$0xff]   ;;  %v2917_v22 = vld [vmem:[#allocation2 + $0x84] ss:$16 sps:$4 sm:$0xff]  }
 0xe5c   :  { %2231 = vpow2.f32 %v1975_v0  ;;  %v2330_v0 = vld [vmem:[#allocation2 + $0x8c] ss:$16 sps:$4 sm:$0xff]  }
 0xe63   :  { %v2226_v60 = vpop.eup %2225 }
 0xe64   :  { %1144 = vrot.lane.b32.xlu1 %v2226_v60, %s2395_s3  ;;  %v2228_v38 = vpop.eup %2227  ;;  %v2326_v60 = vld [vmem:[#allocation2 + $0x48] ss:$16 sps:$4 sm:$0xff]  }
 0xe65   :  { %1177 = vrot.lane.b32.xlu0 %v2228_v38, %s2395_s3  ;;  %v2230_v20 = vpop.eup %2229  ;;  %v2327_v38 = vld [vmem:[#allocation2 + $0x6c] ss:$16 sps:$4 sm:$0xff]  }
 0xe66   :  { %v1135_v27 = vadd.f32 1.0, %v2230_v20  ;;  %v2232_v29 = vpop.eup %2231  ;;  %v2920_v20 = vld [vmem:[#allocation2 + $0x80] ss:$16 sps:$4 sm:$0xff]  }
 0xe67   :  { %v1168_v30 = vadd.f32 1.0, %v2232_v29  ;;  %v2923_v29 = vld [vmem:[#allocation2 + $0xa4] ss:$16 sps:$4 sm:$0xff]  }
 0xe68   :  { %2233 = vrcp.f32 %v1135_v27  ;;  %v2332_v27 = vld [vmem:[#allocation2 + $0x88] ss:$16 sps:$4 sm:$0xff]  }
 0xe69   :  { %2235 = vrcp.f32 %v1168_v30  ;;  %v2334_v30 = vld [vmem:[#allocation2 + $0xac] ss:$16 sps:$4 sm:$0xff]  }
 0xe72   :  { %v2234_v32 = vpop.eup %2233 }
 0xe73   :  { %v2236_v17 = vpop.eup %2235  ;;  %v1142_v26 = vmul.f32 %v2234_v32, %v2826_v28 }
 0xe74   :  { %v1175_v23 = vmul.f32 %v2236_v17, %v2830_v31 }
 0xed6   :  { %v1145_v34 = vpop.permute.xlu1 %1144 }
 0xed7   :  { %v1147_v40 = vmul.f32 %v2234_v32, %v1145_v34  ;;  %v1178_v7 = vpop.permute.xlu0 %1177  ;;  %v2926_v32 = vld [vmem:[#allocation2 + $0xa0] ss:$16 sps:$4 sm:$0xff]   ;;  %v2336_v34 = vld [vmem:[#allocation2 + $0xa8] ss:$16 sps:$4 sm:$0xff]  }
 0xed8   :  { %v1180_v63 = vmul.f32 %v2236_v17, %v1178_v7  ;;  %v2338_v17 = vld [vmem:[#allocation2 + $0xcc] ss:$16 sps:$4 sm:$0xff]   ;;  %v2932_v7 = vld [vmem:[#allocation2 + $0xc0] ss:$16 sps:$4 sm:$0xff]  }
 0xed9   :  { %1149 = vrot.lane.b32.xlu1 %v1147_v40, %s2395_s3  ;;  %v2929_v40 = vld [vmem:[#allocation2 + $0xc4] ss:$16 sps:$4 sm:$0xff]  }
 0xeda   :  { %1182 = vrot.lane.b32.xlu0 %v1180_v63, %s2395_s3  ;;  %v211_v63 = vadd.f32 %v2663_v5, %v2473_v18 }
 0xf4b   :  { %v1150_v37 = vpop.permute.xlu1 %1149 }
 0xf4c   :  { %v2897_v11 = vadd.f32 %v1150_v37, %v1142_v26  ;;  %v1183_v33 = vpop.permute.xlu0 %1182  ;;  %v213_v26 = vadd.f32 %v2665_v6, %v2462_v10 }
 0xf4d   :  { %v2901_v39 = vadd.f32 %v1183_v33, %v1175_v23 }
 0xf4e   :  { %2237 = vtanh.f32 %v2897_v11 }
 0xf4f   :  { %2239 = vtanh.f32 %v2901_v39 }
 0xf50   :  { %2241 = vpow2.f32 %v1974_v19 }
 0xf58   :  { %v2238_v14 = vpop.eup %2237 }
 0xf59   :  { %1155 = vrot.lane.b32.xlu1 %v2238_v14, %s2395_s3  ;;  %v2240_v16 = vpop.eup %2239 }
 0xf5a   :  { %1188 = vrot.lane.b32.xlu0 %v2240_v16, %s2395_s3  ;;  %v2242_v28 = vpop.eup %2241 }
 0xf5b   :  { %v1136_v12 = vadd.f32 1.0, %v2242_v28 }
 0xf5d   :  { %2243 = vrcp.f32 %v1136_v12 }
 0xf5e   :  { %2245 = vpow2.f32 %v1976_v50 }
 0xf67   :  { %v2244_v21 = vpop.eup %2243 }
 0xf68   :  { %v2246_v51 = vpop.eup %2245 }
 0xf69   :  { %v1169_v52 = vadd.f32 1.0, %v2246_v51 }
 0xf6b   :  { %2247 = vrcp.f32 %v1169_v52 }
 0xf75   :  { %v2248_v42 = vpop.eup %2247 }
 0xfcb   :  { %v1156_v15 = vpop.permute.xlu1 %1155 }
 0xfcc   :  { %v1158_v49 = vmul.f32 %v2244_v21, %v1156_v15  ;;  %v1189_v41 = vpop.permute.xlu0 %1188 }
 0xfcd   :  { %v1191_v43 = vmul.f32 %v2248_v42, %v1189_v41 }
 0xfce   :  { %v1159_v31 = vpack.c.bf16 %v1158_v49, %v1158_v49 }
 0xfcf   :  { %v1192_v44 = vpack.c.bf16 %v1191_v43, %v1191_v43 }
 0xfd0   :  { %1194 = vrot.lane.b32.xlu1 %v1159_v31, %s2395_s3 }
0x1042   :  { %v1195_v36 = vpop.permute.xlu1 %1194 }
0x1043   :  { %v1198_v53 = vsel %vm330_vm2, %v1192_v44, %v1195_v36 }
0x1044   :  { %1233 = vmatmul.mubr.bf16.vlgmr.msra.gmra.mrb[32].mxu0 %v1198_v53  ;;  %1274 = vmatmul.mubr.bf16.vlgmr.msra.gmra.mrb[24].mxu1 %v1198_v53 }
0x1045   :  { %1356 = vmatpush1.bf16.msra.mxu0 %v2837_v13  ;;  %1397 = vmatpush1.bf16.msra.mxu1 %v2322_v55 }
0x1046   :  { %1357 = vmatprep.subr.bf16.mxu0 %v2841_v25  ;;  %1398 = vmatprep.subr.bf16.mxu1 %v2323_v46 }
0x1047   :  { %1387 = vmatprep.mubr.bf16.mxu0 %v3031_v24  ;;  %1428 = vmatprep.mubr.bf16.mxu1 %v3031_v24 }
0x1049   :  { %1358 = vmatpush1.bf16.msra.mxu0 %v2847_v35  ;;  %1399 = vmatpush1.bf16.msra.mxu1 %v2324_v56 }
0x104a   :  { %1359 = vmatprep.subr.bf16.mxu0 %v2851_v58  ;;  %1400 = vmatprep.subr.bf16.mxu1 %v2325_v59 }
0x104d   :  { %1360 = vmatpush1.bf16.msra.mxu0 %v2855_v45  ;;  %1401 = vmatpush1.bf16.msra.mxu1 %v2326_v60 }
0x104e   :  { %1361 = vmatprep.subr.bf16.mxu0 %v2859_v47  ;;  %1402 = vmatprep.subr.bf16.mxu1 %v2327_v38 }
0x1051   :  { %1362 = vmatpush1.bf16.msra.mxu0 %v2863_v57  ;;  %1403 = vmatpush1.bf16.msra.mxu1 %v2328_v3 }
0x1052   :  { %1363 = vmatprep.subr.bf16.mxu0 %v2917_v22  ;;  %1404 = vmatprep.subr.bf16.mxu1 %v2330_v0 }
0x1055   :  { %1364 = vmatpush1.bf16.msra.mxu0 %v2920_v20  ;;  %1405 = vmatpush1.bf16.msra.mxu1 %v2332_v27 }
0x1056   :  { %1365 = vmatprep.subr.bf16.mxu0 %v2923_v29  ;;  %1406 = vmatprep.subr.bf16.mxu1 %v2334_v30 }
0x1059   :  { %1366 = vmatpush1.bf16.msra.mxu0 %v2926_v32  ;;  %1407 = vmatpush1.bf16.msra.mxu1 %v2336_v34 }
0x105a   :  { %1367 = vmatprep.subr.bf16.mxu0 %v2929_v40  ;;  %1408 = vmatprep.subr.bf16.mxu1 %v2338_v17 }
0x105d   :  { %1368 = vmatpush1.bf16.msra.mxu0 %v2932_v7  ;;  %1409 = vmatpush1.bf16.msra.mxu1 %v2620_v61 }
0x105e   :  { %1369 = vmatprep.subr.bf16.mxu0 %v2622_v62  ;;  %1410 = vmatprep.subr.bf16.mxu1 %v2626_v1 }
0x1061   :  { %1370 = vmatpush1.bf16.msra.mxu0 %v2631_v2  ;;  %1411 = vmatpush1.bf16.msra.mxu1 %v2635_v4 }
0x1062   :  { %1510 = vmatprep.subr.bf16.mxu0 %v2883_v48 }
0x1117   :  { %v1234_v37 = vpop.f32.mrb[32].mxu0  ;;  %v1275_v23 = vpop.f32.mrb[24].mxu1 }
0x1118   :  { %v1315_v33 = vadd.f32 %v1275_v23, %v211_v63  ;;  %v1236_v61 = vpop.f32.mrb[33].mxu0  ;;  %v1277_v14 = vpop.f32.mrb[25].mxu1  ;;  %v1282_v6 = vadd.f32 %v1234_v37, %v2568_v8 }
0x1119   :  { %v1283_v62 = vadd.f32 %v1236_v61, %v2551_v54  ;;  %v1316_v1 = vadd.f32 %v1277_v14, %v213_v26  ;;  %v1238_v16 = vpop.f32.mrb[34].mxu0  ;;  %v1279_v2 = vpop.f32.mrb[26].mxu1 }
0x111a   :  { %v1239_v19 = vpop.f32.mrb[35].mxu0  ;;  %v1280_v4 = vpop.f32.mrb[27].mxu1  ;;  %v1977_v28 = vmul.f32 -1.442695, %v1282_v6  ;;  %v1979_v12 = vmul.f32 -1.442695, %v1315_v33 }
0x111b   :  { %2249 = vtanh.f32 %v1283_v62  ;;  %v1978_v38 = vmul.f32 -1.442695, %v1283_v62  ;;  %v1980_v34 = vmul.f32 -1.442695, %v1316_v1 }
0x111c   :  { %2251 = vtanh.f32 %v1316_v1 }
0x111d   :  { %2253 = vpow2.f32 %v1977_v28 }
0x111e   :  { %2255 = vpow2.f32 %v1979_v12 }
0x1125   :  { %v2250_v48 = vpop.eup %2249 }
0x1126   :  { %1299 = vrot.lane.b32.xlu0 %v2250_v48, %s2395_s3  ;;  %v2252_v5 = vpop.eup %2251 }
0x1127   :  { %1332 = vrot.lane.b32.xlu1 %v2252_v5, %s2395_s3  ;;  %v2254_v21 = vpop.eup %2253 }
0x1128   :  { %v1290_v15 = vadd.f32 1.0, %v2254_v21  ;;  %v2256_v49 = vpop.eup %2255 }
0x1129   :  { %v1323_v31 = vadd.f32 1.0, %v2256_v49 }
0x112a   :  { %2257 = vrcp.f32 %v1290_v15 }
0x112b   :  { %2259 = vrcp.f32 %v1323_v31 }
0x1134   :  { %v2258_v50 = vpop.eup %2257 }
0x1135   :  { %v2260_v41 = vpop.eup %2259  ;;  %v1297_v44 = vmul.f32 %v2258_v50, %v2897_v11 }
0x1136   :  { %v1330_v55 = vmul.f32 %v2260_v41, %v2901_v39 }
0x1198   :  { %v1300_v51 = vpop.permute.xlu0 %1299 }
0x1199   :  { %v1302_v52 = vmul.f32 %v2258_v50, %v1300_v51  ;;  %v1333_v42 = vpop.permute.xlu1 %1332 }
0x119a   :  { %v1335_v43 = vmul.f32 %v2260_v41, %v1333_v42 }
0x119b   :  { %1304 = vrot.lane.b32.xlu0 %v1302_v52, %s2395_s3 }
0x119c   :  { %1337 = vrot.lane.b32.xlu1 %v1335_v43, %s2395_s3 }
0x120d   :  { %v1305_v36 = vpop.permute.xlu0 %1304 }
0x120e   :  { %v2952_v53 = vadd.f32 %v1305_v36, %v1297_v44  ;;  %v1338_v46 = vpop.permute.xlu1 %1337 }
0x120f   :  { %v2956_v56 = vadd.f32 %v1338_v46, %v1330_v55  ;;  %v1583_v46 = vld [vmem:[#allocation4 + $0x10] sm:$0x3f] }
0x1210   :  { %2261 = vtanh.f32 %v2952_v53 }
0x1211   :  { %2263 = vtanh.f32 %v2956_v56 }
0x1212   :  { %2265 = vpow2.f32 %v1978_v38 }
0x121a   :  { %v2262_v59 = vpop.eup %2261 }
0x121b   :  { %1310 = vrot.lane.b32.xlu0 %v2262_v59, %s2395_s3  ;;  %v2264_v60 = vpop.eup %2263  ;;  %v2396_v59 = vmov 0.0  }
0x121c   :  { %1343 = vrot.lane.b32.xlu1 %v2264_v60, %s2395_s3  ;;  %v2266_v11 = vpop.eup %2265  ;;  %2008 = vmatprep.subr.mxu1 %v2396_v59 }
0x121d   :  { %v1291_v3 = vadd.f32 1.0, %v2266_v11 }
0x121f   :  { %2267 = vrcp.f32 %v1291_v3 }
0x1220   :  { %2269 = vpow2.f32 %v1980_v34 }
0x1229   :  { %v2268_v0 = vpop.eup %2267 }
0x122a   :  { %v2270_v17 = vpop.eup %2269 }
0x122b   :  { %v1324_v63 = vadd.f32 1.0, %v2270_v17 }
0x122d   :  { %2271 = vrcp.f32 %v1324_v63 }
0x1237   :  { %v2272_v37 = vpop.eup %2271 }
0x128d   :  { %v1311_v27 = vpop.permute.xlu0 %1310 }
0x128e   :  { %v1313_v30 = vmul.f32 %v2268_v0, %v1311_v27  ;;  %v1344_v26 = vpop.permute.xlu1 %1343 }
0x128f   :  { %v1346_v23 = vmul.f32 %v2272_v37, %v1344_v26 }
0x1290   :  { %v1314_v39 = vpack.c.bf16 %v1313_v30, %v1313_v30 }
0x1291   :  { %v1347_v33 = vpack.c.bf16 %v1346_v23, %v1346_v23 }
0x1292   :  { %1349 = vrot.lane.b32.xlu0 %v1314_v39, %s2395_s3 }
0x1304   :  { %v1350_v61 = vpop.permute.xlu0 %1349 }
0x1305   :  { %v1353_v14 = vsel %vm330_vm2, %v1347_v33, %v1350_v61 }
0x1306   :  { %1388 = vmatmul.mubr.bf16.vlgmr.msra.gmra.mrb[36].mxu0 %v1353_v14  ;;  %1429 = vmatmul.mubr.bf16.vlgmr.msra.gmra.mrb[28].mxu1 %v1353_v14 }
0x1307   :  { %1511 = vmatpush1.bf16.msra.mxu0 %v2837_v13  ;;  %1542 = vmatprep.mubr.bf16.mxu0 %v3031_v24  ;;  %v2340_v24 = vld [vmem:[#allocation2 + $0xe4] ss:$16 sps:$4 sm:$0xff]   ;;  %v2341_v13 = vld [vmem:[#allocation2 + $0xe0] ss:$16 sps:$4 sm:$0xff]  }
0x1308   :  { %1512 = vmatprep.subr.bf16.mxu0 %v2841_v25  ;;  %v215_v25 = vadd.f32 %v2667_v9, %v2473_v18  ;;  %2010 = vmatprep.mubr.msk.f32.mxu1 %vm2397_vm4, %v2396_v59 }
0x1309   :  { %2009 = vmatpush3.msk.msra.mxu1 %vm1591_vm3, %v1583_v46 }
0x130a   :  { %2013 = vmatprep.subr.mxu1 %v2396_v59 }
0x130b   :  { %1513 = vmatpush1.bf16.msra.mxu0 %v2847_v35  ;;  %v3032_v35 = vld [vmem:[#allocation8_spill] sm:$0xff] }
0x130c   :  { %1514 = vmatprep.subr.bf16.mxu0 %v2851_v58  ;;  %v217_v58 = vadd.f32 %v3032_v35, %v2462_v10  ;;  %v1584_v35 = vld [vmem:[#allocation4 + $0x20] sm:$0xff] }
0x130f   :  { %1515 = vmatpush1.bf16.msra.mxu0 %v2855_v45 }
0x1310   :  { %1516 = vmatprep.subr.bf16.mxu0 %v2859_v47 }
0x1313   :  { %1517 = vmatpush1.bf16.msra.mxu0 %v2863_v57 }
0x1314   :  { %1518 = vmatprep.subr.bf16.mxu0 %v2917_v22 }
0x1317   :  { %1519 = vmatpush1.bf16.msra.mxu0 %v2920_v20 }
0x1318   :  { %1520 = vmatprep.subr.bf16.mxu0 %v2923_v29 }
0x131b   :  { %1521 = vmatpush1.bf16.msra.mxu0 %v2926_v32 }
0x131c   :  { %1522 = vmatprep.subr.bf16.mxu0 %v2929_v40 }
0x131f   :  { %1523 = vmatpush1.bf16.msra.mxu0 %v2932_v7 }
0x1320   :  { %1524 = vmatprep.subr.bf16.mxu0 %v2340_v24 }
0x1323   :  { %1525 = vmatpush1.bf16.msra.mxu0 %v2341_v13  ;;  %v1586_v13 = vld [vmem:[#allocation4 + $0x2] ss:$0 sm:$0xff] }
0x13d9   :  { %v1389_v45 = vpop.f32.mrb[36].mxu0  ;;  %v1430_v47 = vpop.f32.mrb[28].mxu1 }
0x13da   :  { %v1470_v57 = vadd.f32 %v1430_v47, %v215_v25  ;;  %v1391_v22 = vpop.f32.mrb[37].mxu0  ;;  %v1432_v20 = vpop.f32.mrb[29].mxu1  ;;  %v1437_v9 = vadd.f32 %v1389_v45, %v2568_v8 }
0x13db   :  { %v1438_v29 = vadd.f32 %v1391_v22, %v2551_v54  ;;  %v2982_v32 = vadd.f32 %v1432_v20, %v217_v58  ;;  %v1393_v40 = vpop.f32.mrb[38].mxu0  ;;  %v1434_v7 = vpop.f32.mrb[30].mxu1 }
0x13dc   :  { %v1394_v62 = vpop.f32.mrb[39].mxu0  ;;  %v1435_v1 = vpop.f32.mrb[31].mxu1  ;;  %v1981_v16 = vmul.f32 -1.442695, %v1437_v9  ;;  %v1983_v2 = vmul.f32 -1.442695, %v1470_v57 }
0x13dd   :  { %2273 = vtanh.f32 %v1438_v29  ;;  %v1982_v36 = vmul.f32 -1.442695, %v1438_v29  ;;  %v1984_v0 = vmul.f32 -1.442695, %v2982_v32  ;;  %v1741_v62 = vld [vmem:[#allocation4 + $0x30] sm:$0xff]  ;;  %v1742_v1 = vld [vmem:[#allocation4 + $0x40] sm:$0xff] }
0x13de   :  { %2275 = vtanh.f32 %v2982_v32  ;;  %v1743_v9 = vld [vmem:[#allocation4 + $0x50] sm:$0xff] }
0x13df   :  { %2277 = vpow2.f32 %v1981_v16  ;;  %v1744_v16 = vld [vmem:[#allocation4 + $0x60] sm:$0xff] }
0x13e0   :  { %2279 = vpow2.f32 %v1983_v2  ;;  %v1749_v2 = vld [vmem:[#allocation4 + $0xb0] sm:$0xf] }
0x13e7   :  { %v2274_v18 = vpop.eup %2273 }
0x13e8   :  { %1454 = vrot.lane.b32.xlu1 %v2274_v18, %s2395_s3  ;;  %v2276_v10 = vpop.eup %2275  ;;  %v2398_v18 = vmov 0.0|0.0  }
0x13e9   :  { %1487 = vrot.lane.b32.xlu0 %v2276_v10, %s2395_s3  ;;  %v2278_v19 = vpop.eup %2277  ;;  %2042 = vmatprep.subr.bf16.mxu0 %v2398_v18  ;;  %v2043_v10 = vpack.c.bf16 %v1742_v1, %v1741_v62 }
0x13ea   :  { %v1445_v4 = vadd.f32 1.0, %v2278_v19  ;;  %v2280_v48 = vpop.eup %2279  ;;  %v1745_v19 = vld [vmem:[#allocation4 + $0x70] sm:$0xff] }
0x13eb   :  { %v1478_v5 = vadd.f32 1.0, %v2280_v48 }
0x13ec   :  { %2281 = vrcp.f32 %v1445_v4  ;;  %v1746_v4 = vld [vmem:[#allocation4 + $0x80] sm:$0xff] }
0x13ed   :  { %2283 = vrcp.f32 %v1478_v5  ;;  %v2049_v48 = vpack.c.bf16 %v1746_v4, %v1745_v19  ;;  %v1747_v5 = vld [vmem:[#allocation4 + $0x90] sm:$0xff] }
0x13f6   :  { %v2282_v6 = vpop.eup %2281 }
0x13f7   :  { %v2284_v21 = vpop.eup %2283  ;;  %v1452_v31 = vmul.f32 %v2282_v6, %v2952_v53 }
0x13f8   :  { %v1485_v52 = vmul.f32 %v2284_v21, %v2956_v56  ;;  %v1585_v56 = vld [vmem:[%s3024_s1] sm:$0xff] }
0x13f9   :  { %2011 = vmatmul.mubr.msk.f32.vlgmr.msra.gmra.mrb[32].mxu1 %vm1587_vm5, %v1585_v56 }
0x13fa   :  { %2015 = vmatprep.mubr.msk.f32.mxu1 %vm2397_vm4, %v2396_v59  ;;  %2014 = vmatpush3.msra.mxu1 %v1584_v35 }
0x13fb   :  { %2018 = vmatprep.subr.mxu1 %v2396_v59 }
0x145a   :  { %v1455_v28 = vpop.permute.xlu1 %1454 }
0x145b   :  { %v1457_v12 = vmul.f32 %v2282_v6, %v1455_v28  ;;  %v1488_v15 = vpop.permute.xlu0 %1487  ;;  %v1748_v6 = vld [vmem:[#allocation4 + $0xa0] sm:$0xff] }
0x145c   :  { %v1490_v49 = vmul.f32 %v2284_v21, %v1488_v15  ;;  %v2052_v28 = vpack.c.bf16 %v1748_v6, %v1747_v5 }
0x145d   :  { %1459 = vrot.lane.b32.xlu1 %v1457_v12, %s2395_s3  ;;  %v1666_v12 = vld [vmem:[#allocation4 + $0x3] ss:$0 sm:$0xff] }
0x145e   :  { %1492 = vrot.lane.b32.xlu0 %v1490_v49, %s2395_s3 }
0x14cc   :  { %v1661_v25 = vpop.f32.mrb[32].mxu1 }
0x14cd   :  { %v1662_v58 = vadd.f32 %v1661_v25, %v1586_v13  ;;  %v2012_v45 = vpop.f32.mrb[33].mxu1 }
0x14cf   :  { %v1460_v50 = vpop.permute.xlu1 %1459 }
0x14d0   :  { %v2991_v51 = vadd.f32 %v1460_v50, %v1452_v31  ;;  %v1493_v41 = vpop.permute.xlu0 %1492 }
0x14d1   :  { %v1495_v42 = vadd.f32 %v1493_v41, %v1485_v52 }
0x14d2   :  { %2285 = vtanh.f32 %v2991_v51 }
0x14d3   :  { %2287 = vtanh.f32 %v1495_v42 }
0x14d4   :  { %2289 = vpow2.f32 %v1982_v36 }
0x14dc   :  { %v2286_v43 = vpop.eup %2285 }
0x14dd   :  { %1465 = vrot.lane.b32.xlu1 %v2286_v43, %s2395_s3  ;;  %v2288_v44 = vpop.eup %2287 }
0x14de   :  { %1498 = vrot.lane.b32.xlu0 %v2288_v44, %s2395_s3  ;;  %v2290_v55 = vpop.eup %2289 }
0x14df   :  { %v1446_v53 = vadd.f32 1.0, %v2290_v55 }
0x14e1   :  { %2291 = vrcp.f32 %v1446_v53 }
0x14e2   :  { %2293 = vpow2.f32 %v1984_v0 }
0x14eb   :  { %v2292_v60 = vpop.eup %2291 }
0x14ec   :  { %v2294_v27 = vpop.eup %2293 }
0x14ed   :  { %v1479_v30 = vadd.f32 1.0, %v2294_v27 }
0x14ef   :  { %2295 = vrcp.f32 %v1479_v30 }
0x14f9   :  { %v2296_v34 = vpop.eup %2295 }
0x154f   :  { %v1466_v38 = vpop.permute.xlu1 %1465 }
0x1550   :  { %v1468_v11 = vmul.f32 %v2292_v60, %v1466_v38  ;;  %v1499_v39 = vpop.permute.xlu0 %1498  ;;  %v1900_v60 = vld [vmem:[#allocation4 + $0x4] ss:$0 sm:$0xff] }
0x1551   :  { %v1501_v17 = vmul.f32 %v2296_v34, %v1499_v39 }
0x1552   :  { %v1469_v3 = vpack.c.bf16 %v1468_v11, %v1468_v11 }
0x1553   :  { %v1502_v63 = vpack.c.bf16 %v1501_v17, %v1501_v17 }
0x1554   :  { %1504 = vrot.lane.b32.xlu1 %v1469_v3, %s2395_s3 }
0x15c6   :  { %v1505_v26 = vpop.permute.xlu1 %1504 }
0x15c7   :  { %v1508_v37 = vsel %vm330_vm2, %v1502_v63, %v1505_v26 }
0x15c8   :  { %1543 = vmatmul.mubr.bf16.vlgmr.msra.gmra.mrb[40].mxu0 %v1508_v37 }
0x15c9   :  { %2039 = vmatprep.mubr.msk.f32.mxu0 %vm2397_vm4, %v2396_v59  ;;  %2044 = vmatpush3.bf16.msra.mxu0 %v2043_v10 }
0x15ca   :  { %2045 = vmatprep.subr.bf16.mxu0 %v2398_v18 }
0x169b   :  { %v1544_v23 = vpop.f32.mrb[40].mxu0 }
0x169c   :  { %v1546_v33 = vpop.f32.mrb[41].mxu0 }
0x169d   :  { %v3007_v61 = vadd.f32 %v1546_v33, %v2551_v54  ;;  %v1548_v14 = vpop.f32.mrb[42].mxu0  ;;  %v1551_v54 = vadd.f32 %v1544_v23, %v2568_v8  ;;  %v2046_v8 = vpack.c.bf16 %v1744_v16, %v1743_v9 }
0x169e   :  { %v1549_v24 = vpop.f32.mrb[43].mxu0 }
0x169f   :  { %2297 = vtanh.f32 %v3007_v61  ;;  %v1985_v22 = vmul.f32 -1.442695, %v1551_v54  ;;  %2047 = vmatpush3.bf16.msra.mxu0 %v2046_v8  ;;  %v1986_v43 = vmul.f32 -1.442695, %v3007_v61 }
0x16a0   :  { %2299 = vtanh.f32 %v1662_v58  ;;  %2048 = vmatprep.subr.bf16.mxu0 %v2398_v18 }
0x16a1   :  { %2301 = vpow2.f32 %v1985_v22 }
0x16a3   :  { %2050 = vmatpush3.bf16.msra.mxu0 %v2049_v48 }
0x16a4   :  { %2051 = vmatprep.subr.bf16.mxu0 %v2398_v18 }
0x16a7   :  { %2053 = vmatpush3.bf16.msra.mxu0 %v2052_v28 }
0x16a9   :  { %v2298_v47 = vpop.eup %2297 }
0x16aa   :  { %1568 = vrot.lane.b32.xlu0 %v2298_v47, %s2395_s3  ;;  %v2300_v57 = vpop.eup %2299 }
0x16ab   :  { %2016 = vmatmul.mubr.msk.f32.vlgmr.msra.gmra.mrb[34].mxu1 %vm126_vm1, %v2300_v57  ;;  %v2302_v20 = vpop.eup %2301 }
0x16ac   :  { %2020 = vmatprep.mubr.msk.f32.mxu1 %vm2397_vm4, %v2396_v59  ;;  %v1559_v29 = vadd.f32 1.0, %v2302_v20  ;;  %2019 = vmatpush3.msk.msra.mxu1 %vm139_vm0, %v1749_v2 }
0x16ae   :  { %2303 = vrcp.f32 %v1559_v29 }
0x16b8   :  { %v2304_v32 = vpop.eup %2303 }
0x16b9   :  { %v1566_v50 = vmul.f32 %v2304_v32, %v2991_v51 }
0x171c   :  { %v1569_v40 = vpop.permute.xlu0 %1568 }
0x171d   :  { %v1571_v7 = vmul.f32 %v2304_v32, %v1569_v40 }
0x171f   :  { %1573 = vrot.lane.b32.xlu1 %v1571_v7, %s2395_s3 }
0x177e   :  { %v1736_v21 = vpop.f32.mrb[34].mxu1 }
0x177f   :  { %v2017_v15 = vpop.f32.mrb[35].mxu1  ;;  %v1737_v49 = vadd.f32 %v1736_v21, %v1666_v12 }
0x1781   :  { %2305 = vtanh.f32 %v1737_v49 }
0x178b   :  { %v2306_v31 = vpop.eup %2305 }
0x178c   :  { %2021 = vmatmul.mubr.msk.f32.vlgmr.msra.gmra.mrb[36].mxu1 %vm1750_vm6, %v2306_v31 }
0x1791   :  { %v1574_v52 = vpop.permute.xlu1 %1573 }
0x1792   :  { %v1576_v41 = vadd.f32 %v1574_v52, %v1566_v50 }
0x1794   :  { %2307 = vtanh.f32 %v1576_v41 }
0x1795   :  { %2309 = vpow2.f32 %v1986_v43 }
0x179e   :  { %v2308_v42 = vpop.eup %2307 }
0x179f   :  { %1579 = vrot.lane.b32.xlu0 %v2308_v42, %s2395_s3  ;;  %v2310_v44 = vpop.eup %2309 }
0x17a0   :  { %v1560_v36 = vadd.f32 1.0, %v2310_v44 }
0x17a2   :  { %2311 = vrcp.f32 %v1560_v36 }
0x17ac   :  { %v2312_v55 = vpop.eup %2311 }
0x1811   :  { %v1580_v53 = vpop.permute.xlu0 %1579 }
0x1812   :  { %v1582_v46 = vmul.f32 %v2312_v55, %v1580_v53 }
0x1814   :  { %2040 = vmatmul.mubr.msk.f32.vlgmr.msra.gmra.mrb[44].mxu0 %vm330_vm2, %v1582_v46 }
0x185f   :  { %v1823_v51 = vpop.f32.mrb[36].mxu1 }
0x1860   :  { %v2022_v56 = vpop.f32.mrb[37].mxu1 }
0x18e7   :  { %v1896_v59 = vpop.f32.mrb[44].mxu0 }
0x18e8   :  { %v1897_v38 = vadd.f32 %v1896_v59, %v1823_v51  ;;  %v2041_v11 = vpop.f32.mrb[45].mxu0 }
0x18ea   :  { %v1901_v3 = vadd.f32 %v1900_v60, %v1897_v38 }
0x18ec   :  { %1903 = vst.msk [vmem:[%s3027_s4] sm:$0xff] %vm1902_vm7, %v1901_v3 }
0x18ed   :  { %1908 = vsyncpa [#allocation3], 1 }
0x18ee   :  { %1909 = vsyncpa [#allocation5], 1 }

</bundles_post_ra>
